<compile_context>
chip_gen: v5e
topology: v5e:2x2
jax: 0.10.0
libtpu: 0.0.40
codegen_flags: <defaults>
</compile_context>

<pallas_src>
import jax
import jax.numpy as jnp
from jax.experimental import pallas as pl
from jax.experimental.pallas import tpu as pltpu


KSIZE = 7
PAD = 3


# ------------------------------ host-side helpers ------------------------------

def _choose_tiles(B, C, H, W, itemsize):
    """Pick (bt, tc): images per grid step and channels per reduction step."""
    plane_bytes = H * W * itemsize
    # Channel tile: keep one (bt=1) input block <= ~4 MiB (double-buffered ~8 MiB).
    max_tc = max(1, (4 * 1024 * 1024) // max(plane_bytes, 1))
    tc = C
    while tc > 1 and (tc > max_tc or C % tc):
        tc -= 1
    # Batch tile: amortize per-step overhead for tiny images, but keep >= 2 batch
    # steps when B >= 2 so both v7x TensorCores get work.
    bt = 1
    if tc == C:
        img_block = C * plane_bytes
        target = 2 * 1024 * 1024
        bt = max(1, min(B, target // max(img_block, 1)))
        if B >= 2:
            bt = min(bt, B // 2)
        while bt > 1 and B % bt:
            bt -= 1
    return max(bt, 1), max(tc, 1)


def _build_bands(conv_w, W):
    """Banded (Toeplitz) matrices for the MXU conv path.

    bands[c, ky, p, j] = conv_w[0, c, ky, p - j] for 0 <= p - j < 7, else 0,
    so that acc += padded_plane_c[ky:ky+H, :] @ bands[c, ky] realizes the 7x7 conv.
    """
    Wp = W + 2 * PAD
    w = conv_w.reshape(2, KSIZE, KSIZE).astype(jnp.float32)     # (2, 7, 7)
    p = jnp.arange(Wp)[:, None]                                  # (Wp, 1)
    j = jnp.arange(W)[None, :]                                   # (1, W)
    kx = p - j                                                   # (Wp, W)
    valid = (kx >= 0) & (kx < KSIZE)
    kx_c = jnp.clip(kx, 0, KSIZE - 1)
    bands = jnp.where(valid[None, None], w[:, :, kx_c], 0.0)     # (2, 7, Wp, W)
    return bands


def _vmem_limit_bytes(needed_bytes):
    """Generation-aware VMEM cap: grow with the actual block/scratch need,
    never exceed (physical VMEM - 16 MiB)."""
    phys = 64 * 1024 * 1024
    try:
        info = pltpu.get_tpu_info()
        phys = int(getattr(info, "vmem_capacity_bytes", phys) or phys)
    except Exception:
        pass
    want = max(32 * 1024 * 1024, 2 * int(needed_bytes))
    return int(min(want, phys - 16 * 1024 * 1024))


# ------------------------------ Pallas kernel ------------------------------

def _make_kernel(bt, tc, C, H, W, use_mxu):
    inv_c = 1.0 / float(C)
    Hp, Wp = H + 2 * PAD, W + 2 * PAD

    def kernel(x_ref, w_ref, b_ref, o_ref, sum_acc, max_acc, avg_pad, max_pad):
        # Grid: (batch-tile [parallel], channel-tile [arbitrary reduction]).
        c_step = pl.program_id(1)

        # --- channel reduction (running f32 sum / max, per channel chunk) ---
        @pl.when(c_step == 0)
        def _init():
            sum_acc[...] = jnp.zeros((bt, H, W), jnp.float32)
            max_acc[...] = jnp.full((bt, H, W), -jnp.inf, jnp.float32)

        xs = x_ref[...].astype(jnp.float32)                # (bt, tc, H, W)
        sum_acc[...] = sum_acc[...] + jnp.sum(xs, axis=1)  # running sum  -> mean
        max_acc[...] = jnp.maximum(max_acc[...], jnp.max(xs, axis=1))

        # --- finalize: pad halo, 7x7 conv (Cin=2 -> Cout=1), sigmoid, store ---
        @pl.when(c_step == pl.num_programs(1) - 1)
        def _finalize():
            # Zero only the 3-wide border strips (interior is rewritten per image);
            # no full-plane re-zeroing.
            zrow = jnp.zeros((PAD, Wp), jnp.float32)
            zcol = jnp.zeros((H, PAD), jnp.float32)
            for p in (avg_pad, max_pad):
                p[0:PAD, :] = zrow
                p[PAD + H:Hp, :] = zrow
                p[PAD:PAD + H, 0:PAD] = zcol
                p[PAD:PAD + H, PAD + W:Wp] = zcol

            bias = b_ref[0]
            for bi in range(bt):
                avg_pad[PAD:PAD + H, PAD:PAD + W] = sum_acc[bi] * inv_c   # mean plane
                max_pad[PAD:PAD + H, PAD:PAD + W] = max_acc[bi]           # max plane

                # Bias folded into the accumulator init.
                acc = jnp.full((H, W), bias, jnp.float32)

                if use_mxu:
                    # 14 banded matmuls on the (otherwise idle) MXU: no lane/sublane
                    # rotates at all, K = Wp, N = W.
                    for ci, plane in enumerate((avg_pad, max_pad)):   # 0=avg, 1=max (cat order)
                        for ky in range(KSIZE):
                            acc = acc + jnp.dot(
                                plane[ky:ky + H, :], w_ref[ci, ky],
                                preferred_element_type=jnp.float32)
                else:
                    # VPU path: 7 lane-shifted views per plane, weights folded row-wise,
                    # then only 7 sublane-offset slices added into the accumulator.
                    for ci, plane in enumerate((avg_pad, max_pad)):   # 0=avg, 1=max (cat order)
                        shifted = [plane[:, kx:kx + W] for kx in range(KSIZE)]  # (Hp, W) each
                        for ky in range(KSIZE):
                            base = ci * KSIZE * KSIZE + ky * KSIZE
                            g = w_ref[base] * shifted[0]
                            for kx in range(1, KSIZE):
                                g = g + w_ref[base + kx] * shifted[kx]
                            acc = acc + g[ky:ky + H, :]

                o_ref[bi] = jax.nn.sigmoid(acc).astype(o_ref.dtype)

    return kernel


# ------------------------------ wrapper ------------------------------

def spatial_attention(x, conv_w, conv_b):
    """x: (B, C, H, W) NCHW; conv_w: (1, 2, 7, 7) PyTorch layout; conv_b: (1,).

    Returns (B, 1, H, W), matching SpatialAttentionModule.forward.
    """
    B, C, H, W = x.shape
    assert conv_w.shape == (1, 2, KSIZE, KSIZE)
    Hp, Wp = H + 2 * PAD, W + 2 * PAD
    itemsize = x.dtype.itemsize

    bt, tc = _choose_tiles(B, C, H, W, itemsize)
    use_mxu = W >= 64

    b_flat = conv_b.reshape(-1).astype(jnp.float32)               # (1,) SMEM scalar
    if use_mxu:
        w_arg = _build_bands(conv_w, W)                           # (2, 7, Wp, W) VMEM
        w_spec = pl.BlockSpec((2, KSIZE, Wp, W), lambda b, c: (0, 0, 0, 0))
    else:
        w_arg = conv_w.reshape(-1).astype(jnp.float32)            # (98,) SMEM scalars
        w_spec = pl.BlockSpec(memory_space=pltpu.MemorySpace.SMEM)

    # Rough per-step VMEM need: double-buffered in/out blocks + scratch + weights.
    needed = (2 * bt * tc * H * W * itemsize            # input block (x2 buffers)
              + 2 * bt * H * W * itemsize               # output block (x2 buffers)
              + 2 * bt * H * W * 4                      # sum/max accumulators
              + 2 * Hp * Wp * 4                         # padded halo planes
              + int(w_arg.size) * 4)

    out = pl.pallas_call(
        _make_kernel(bt, tc, C, H, W, use_mxu),
        out_shape=jax.ShapeDtypeStruct((B, H, W), x.dtype),
        grid=(B // bt, C // tc),
        in_specs=[
            pl.BlockSpec((bt, tc, H, W), lambda b, c: (b, c, 0, 0)),
            w_spec,
            pl.BlockSpec(memory_space=pltpu.MemorySpace.SMEM),    # bias scalar
        ],
        out_specs=pl.BlockSpec((bt, H, W), lambda b, c: (b, 0, 0)),
        scratch_shapes=[
            pltpu.VMEM((bt, H, W), jnp.float32),   # running channel sum
            pltpu.VMEM((bt, H, W), jnp.float32),   # running channel max
            pltpu.VMEM((Hp, Wp), jnp.float32),     # padded avg plane (halo)
            pltpu.VMEM((Hp, Wp), jnp.float32),     # padded max plane (halo)
        ],
        compiler_params=pltpu.CompilerParams(
            dimension_semantics=("parallel", "arbitrary"),
            vmem_limit_bytes=_vmem_limit_bytes(needed),
        ),
    )(x, w_arg, b_flat)

    return out.reshape(B, 1, H, W)


# ------------------------------ pure-JAX reference ------------------------------

def spatial_attention_ref(x, conv_w, conv_b):
    avg = jnp.mean(x, axis=1, keepdims=True)
    mx = jnp.max(x, axis=1, keepdims=True)
    cat = jnp.concatenate([avg, mx], axis=1)                      # (B, 2, H, W)
    y = jax.lax.conv_general_dilated(
        cat, conv_w, window_strides=(1, 1), padding=((PAD, PAD), (PAD, PAD)),
        dimension_numbers=("NCHW", "OIHW", "NCHW"))
    return jax.nn.sigmoid(y + conv_b.reshape(1, -1, 1, 1))


# ----------------------------------- main ------------------------------------

if __name__ == "__main__":
    key = jax.random.PRNGKey(0)
    k_x, k_w, k_b, k_x2 = jax.random.split(key, 4)

    conv_w = 0.1 * jax.random.normal(k_w, (1, 2, KSIZE, KSIZE), dtype=jnp.float32)
    conv_b = 0.1 * jax.random.normal(k_b, (1,), dtype=jnp.float32)

    # Main small test (W < 64 -> VPU shift-and-accumulate conv path).
    B, C, H, W = 2, 4, 16, 16
    x = jax.random.normal(k_x, (B, C, H, W), dtype=jnp.float32)
    out = jax.block_until_ready(spatial_attention(x, conv_w, conv_b))
    ref = jax.block_until_ready(spatial_attention_ref(x, conv_w, conv_b))
    assert out.shape == (B, 1, H, W)
    assert jnp.allclose(out, ref, atol=1e-5, rtol=1e-5), float(jnp.max(jnp.abs(out - ref)))

    # Secondary check exercising the MXU banded-matmul conv path (W >= 64) and the
    # channel-reduction grid axis.  Looser tolerance covers possible reduced-precision
    # MXU passes for f32 matmuls; structural errors would be orders of magnitude larger.
    B2, C2, H2, W2 = 2, 3, 8, 128
    x2 = jax.random.normal(k_x2, (B2, C2, H2, W2), dtype=jnp.float32)
    out2 = jax.block_until_ready(spatial_attention(x2, conv_w, conv_b))
    ref2 = jax.block_until_ready(spatial_attention_ref(x2, conv_w, conv_b))
    assert out2.shape == (B2, 1, H2, W2)
    assert jnp.allclose(out2, ref2, atol=1e-2, rtol=0), float(jnp.max(jnp.abs(out2 - ref2)))

    print("KERNEL_OK")
</pallas_src>

<mosaic_0001>
module attributes {stable_mosaic.version = 11 : i64} {
  func.func @kernel(%arg0: i32, %arg1: i32, %arg2: memref<1x4x16x16xf32, #tpu.memory_space<vmem>>, %arg3: memref<98xf32, #tpu.memory_space<smem>>, %arg4: memref<1xf32, #tpu.memory_space<smem>>, %arg5: memref<1x16x16xf32, #tpu.memory_space<vmem>>, %arg6: memref<1x16x16xf32, #tpu.memory_space<vmem>>, %arg7: memref<1x16x16xf32, #tpu.memory_space<vmem>>, %arg8: memref<22x22xf32, #tpu.memory_space<vmem>>, %arg9: memref<22x22xf32, #tpu.memory_space<vmem>>) attributes {dimension_semantics = [#tpu.dimension_semantics<parallel>, #tpu.dimension_semantics<arbitrary>], iteration_bounds = array<i64: 2, 1>, scalar_prefetch = 0 : i64, scratch_operands = 4 : i64, tpu.core_type = #tpu.core_type<tc>, window_params = [{transform_indices = @transform_0, window_bounds = array<i64: 1, 4, 16, 16>}, {transform_indices = @transform_1, window_bounds = array<i64: 98>}, {transform_indices = @transform_2, window_bounds = array<i64: 1>}, {transform_indices = @transform_3, window_bounds = array<i64: 1, 16, 16>}]} {
    %c0_i32 = arith.constant 0 : i32
    %0 = arith.cmpi eq, %arg1, %c0_i32 : i32
    %1 = arith.extui %0 : i1 to i32
    %c0_i32_0 = arith.constant 0 : i32
    %2 = arith.cmpi ne, %1, %c0_i32_0 : i32
    scf.if %2 {
      %cst_19 = arith.constant 0.000000e+00 : f32
      %15 = vector.broadcast %cst_19 : f32 to vector<1x16x16xf32>
      %c0_20 = arith.constant 0 : index
      %c0_21 = arith.constant 0 : index
      %c0_22 = arith.constant 0 : index
      %16 = vector.load %arg6[%c0_20, %c0_21, %c0_22] : memref<1x16x16xf32, #tpu.memory_space<vmem>>, vector<1x16x16xf32>
      tpu.vector_store %arg6[%c0_20, %c0_21, %c0_22], %15 {strides = array<i32>} : memref<1x16x16xf32, #tpu.memory_space<vmem>>, vector<1x16x16xf32>,
      %cst_23 = arith.constant 0xFF800000 : f32
      %17 = vector.broadcast %cst_23 : f32 to vector<1x16x16xf32>
      %c0_24 = arith.constant 0 : index
      %c0_25 = arith.constant 0 : index
      %c0_26 = arith.constant 0 : index
      %18 = vector.load %arg7[%c0_24, %c0_25, %c0_26] : memref<1x16x16xf32, #tpu.memory_space<vmem>>, vector<1x16x16xf32>
      tpu.vector_store %arg7[%c0_24, %c0_25, %c0_26], %17 {strides = array<i32>} : memref<1x16x16xf32, #tpu.memory_space<vmem>>, vector<1x16x16xf32>,
    } else {
    }
    %c0 = arith.constant 0 : index
    %c0_1 = arith.constant 0 : index
    %c0_2 = arith.constant 0 : index
    %c0_3 = arith.constant 0 : index
    %3 = vector.load %arg2[%c0, %c0_1, %c0_2, %c0_3] : memref<1x4x16x16xf32, #tpu.memory_space<vmem>>, vector<1x4x16x16xf32>
    %c0_4 = arith.constant 0 : index
    %c0_5 = arith.constant 0 : index
    %c0_6 = arith.constant 0 : index
    %4 = vector.load %arg6[%c0_4, %c0_5, %c0_6] : memref<1x16x16xf32, #tpu.memory_space<vmem>>, vector<1x16x16xf32>
    %cst = arith.constant dense<0.000000e+00> : vector<1x16x16xf32>
    %5 = vector.multi_reduction <add>, %3, %cst [1] : vector<1x4x16x16xf32> to vector<1x16x16xf32>
    %6 = arith.addf %4, %5 : vector<1x16x16xf32>
    %c0_7 = arith.constant 0 : index
    %c0_8 = arith.constant 0 : index
    %c0_9 = arith.constant 0 : index
    %7 = vector.load %arg6[%c0_7, %c0_8, %c0_9] : memref<1x16x16xf32, #tpu.memory_space<vmem>>, vector<1x16x16xf32>
    tpu.vector_store %arg6[%c0_7, %c0_8, %c0_9], %6 {strides = array<i32>} : memref<1x16x16xf32, #tpu.memory_space<vmem>>, vector<1x16x16xf32>,
    %c0_10 = arith.constant 0 : index
    %c0_11 = arith.constant 0 : index
    %c0_12 = arith.constant 0 : index
    %8 = vector.load %arg7[%c0_10, %c0_11, %c0_12] : memref<1x16x16xf32, #tpu.memory_space<vmem>>, vector<1x16x16xf32>
    %cst_13 = arith.constant dense<0xFF800000> : vector<1x16x16xf32>
    %9 = vector.multi_reduction <maximumf>, %3, %cst_13 [1] : vector<1x4x16x16xf32> to vector<1x16x16xf32>
    %10 = arith.maximumf %8, %9 : vector<1x16x16xf32>
    %c0_14 = arith.constant 0 : index
    %c0_15 = arith.constant 0 : index
    %c0_16 = arith.constant 0 : index
    %11 = vector.load %arg7[%c0_14, %c0_15, %c0_16] : memref<1x16x16xf32, #tpu.memory_space<vmem>>, vector<1x16x16xf32>
    tpu.vector_store %arg7[%c0_14, %c0_15, %c0_16], %10 {strides = array<i32>} : memref<1x16x16xf32, #tpu.memory_space<vmem>>, vector<1x16x16xf32>,
    %c0_i32_17 = arith.constant 0 : i32
    %12 = arith.cmpi eq, %arg1, %c0_i32_17 : i32
    %13 = arith.extui %12 : i1 to i32
    %c0_i32_18 = arith.constant 0 : i32
    %14 = arith.cmpi ne, %13, %c0_i32_18 : i32
    scf.if %14 {
      %cst_19 = arith.constant 0.000000e+00 : f32
      %15 = vector.broadcast %cst_19 : f32 to vector<3x22xf32>
      %cst_20 = arith.constant 0.000000e+00 : f32
      %16 = vector.broadcast %cst_20 : f32 to vector<16x3xf32>
      %c0_21 = arith.constant 0 : index
      %c0_22 = arith.constant 0 : index
      %17 = vector.load %arg8[%c0_21, %c0_22] : memref<22x22xf32, #tpu.memory_space<vmem>>, vector<3x22xf32>
      tpu.vector_store %arg8[%c0_21, %c0_22], %15 {strides = array<i32>} : memref<22x22xf32, #tpu.memory_space<vmem>>, vector<3x22xf32>,
      %c19 = arith.constant 19 : index
      %c0_23 = arith.constant 0 : index
      %18 = vector.load %arg8[%c19, %c0_23] : memref<22x22xf32, #tpu.memory_space<vmem>>, vector<3x22xf32>
      tpu.vector_store %arg8[%c19, %c0_23], %15 {strides = array<i32>} : memref<22x22xf32, #tpu.memory_space<vmem>>, vector<3x22xf32>,
      %c3 = arith.constant 3 : index
      %c0_24 = arith.constant 0 : index
      %19 = vector.load %arg8[%c3, %c0_24] : memref<22x22xf32, #tpu.memory_space<vmem>>, vector<16x3xf32>
      tpu.vector_store %arg8[%c3, %c0_24], %16 {strides = array<i32>} : memref<22x22xf32, #tpu.memory_space<vmem>>, vector<16x3xf32>,
      %c3_25 = arith.constant 3 : index
      %c19_26 = arith.constant 19 : index
      %20 = vector.load %arg8[%c3_25, %c19_26] : memref<22x22xf32, #tpu.memory_space<vmem>>, vector<16x3xf32>
      tpu.vector_store %arg8[%c3_25, %c19_26], %16 {strides = array<i32>} : memref<22x22xf32, #tpu.memory_space<vmem>>, vector<16x3xf32>,
      %c0_27 = arith.constant 0 : index
      %c0_28 = arith.constant 0 : index
      %21 = vector.load %arg9[%c0_27, %c0_28] : memref<22x22xf32, #tpu.memory_space<vmem>>, vector<3x22xf32>
      tpu.vector_store %arg9[%c0_27, %c0_28], %15 {strides = array<i32>} : memref<22x22xf32, #tpu.memory_space<vmem>>, vector<3x22xf32>,
      %c19_29 = arith.constant 19 : index
      %c0_30 = arith.constant 0 : index
      %22 = vector.load %arg9[%c19_29, %c0_30] : memref<22x22xf32, #tpu.memory_space<vmem>>, vector<3x22xf32>
      tpu.vector_store %arg9[%c19_29, %c0_30], %15 {strides = array<i32>} : memref<22x22xf32, #tpu.memory_space<vmem>>, vector<3x22xf32>,
      %c3_31 = arith.constant 3 : index
      %c0_32 = arith.constant 0 : index
      %23 = vector.load %arg9[%c3_31, %c0_32] : memref<22x22xf32, #tpu.memory_space<vmem>>, vector<16x3xf32>
      tpu.vector_store %arg9[%c3_31, %c0_32], %16 {strides = array<i32>} : memref<22x22xf32, #tpu.memory_space<vmem>>, vector<16x3xf32>,
      %c3_33 = arith.constant 3 : index
      %c19_34 = arith.constant 19 : index
      %24 = vector.load %arg9[%c3_33, %c19_34] : memref<22x22xf32, #tpu.memory_space<vmem>>, vector<16x3xf32>
      tpu.vector_store %arg9[%c3_33, %c19_34], %16 {strides = array<i32>} : memref<22x22xf32, #tpu.memory_space<vmem>>, vector<16x3xf32>,
      %c0_35 = arith.constant 0 : index
      %25 = memref.load %arg4[%c0_35] : memref<1xf32, #tpu.memory_space<smem>>
      %c0_36 = arith.constant 0 : index
      %c0_37 = arith.constant 0 : index
      %c0_38 = arith.constant 0 : index
      %26 = vector.load %arg6[%c0_36, %c0_37, %c0_38] : memref<1x16x16xf32, #tpu.memory_space<vmem>>, vector<1x16x16xf32>
      %27 = vector.shape_cast %26 : vector<1x16x16xf32> to vector<16x16xf32>
      %cst_39 = arith.constant 2.500000e-01 : f32
      %28 = vector.broadcast %cst_39 : f32 to vector<16x16xf32>
      %29 = arith.mulf %27, %28 : vector<16x16xf32>
      %c3_40 = arith.constant 3 : index
      %c3_41 = arith.constant 3 : index
      %30 = vector.load %arg8[%c3_40, %c3_41] : memref<22x22xf32, #tpu.memory_space<vmem>>, vector<16x16xf32>
      tpu.vector_store %arg8[%c3_40, %c3_41], %29 {strides = array<i32>} : memref<22x22xf32, #tpu.memory_space<vmem>>, vector<16x16xf32>,
      %c0_42 = arith.constant 0 : index
      %c0_43 = arith.constant 0 : index
      %c0_44 = arith.constant 0 : index
      %31 = vector.load %arg7[%c0_42, %c0_43, %c0_44] : memref<1x16x16xf32, #tpu.memory_space<vmem>>, vector<1x16x16xf32>
      %32 = vector.shape_cast %31 : vector<1x16x16xf32> to vector<16x16xf32>
      %c3_45 = arith.constant 3 : index
      %c3_46 = arith.constant 3 : index
      %33 = vector.load %arg9[%c3_45, %c3_46] : memref<22x22xf32, #tpu.memory_space<vmem>>, vector<16x16xf32>
      tpu.vector_store %arg9[%c3_45, %c3_46], %32 {strides = array<i32>} : memref<22x22xf32, #tpu.memory_space<vmem>>, vector<16x16xf32>,
      %34 = vector.broadcast %25 : f32 to vector<16x16xf32>
      %c0_47 = arith.constant 0 : index
      %c0_48 = arith.constant 0 : index
      %35 = vector.load %arg8[%c0_47, %c0_48] : memref<22x22xf32, #tpu.memory_space<vmem>>, vector<22x16xf32>
      %c0_49 = arith.constant 0 : index
      %c1 = arith.constant 1 : index
      %36 = vector.load %arg8[%c0_49, %c1] : memref<22x22xf32, #tpu.memory_space<vmem>>, vector<22x16xf32>
      %c0_50 = arith.constant 0 : index
      %c2 = arith.constant 2 : index
      %37 = vector.load %arg8[%c0_50, %c2] : memref<22x22xf32, #tpu.memory_space<vmem>>, vector<22x16xf32>
      %c0_51 = arith.constant 0 : index
      %c3_52 = arith.constant 3 : index
      %38 = vector.load %arg8[%c0_51, %c3_52] : memref<22x22xf32, #tpu.memory_space<vmem>>, vector<22x16xf32>
      %c0_53 = arith.constant 0 : index
      %c4 = arith.constant 4 : index
      %39 = vector.load %arg8[%c0_53, %c4] : memref<22x22xf32, #tpu.memory_space<vmem>>, vector<22x16xf32>
      %c0_54 = arith.constant 0 : index
      %c5 = arith.constant 5 : index
      %40 = vector.load %arg8[%c0_54, %c5] : memref<22x22xf32, #tpu.memory_space<vmem>>, vector<22x16xf32>
      %c0_55 = arith.constant 0 : index
      %c6 = arith.constant 6 : index
      %41 = vector.load %arg8[%c0_55, %c6] : memref<22x22xf32, #tpu.memory_space<vmem>>, vector<22x16xf32>
      %c0_56 = arith.constant 0 : index
      %42 = memref.load %arg3[%c0_56] : memref<98xf32, #tpu.memory_space<smem>>
      %43 = vector.broadcast %42 : f32 to vector<22x16xf32>
      %44 = arith.mulf %43, %35 : vector<22x16xf32>
      %c1_57 = arith.constant 1 : index
      %45 = memref.load %arg3[%c1_57] : memref<98xf32, #tpu.memory_space<smem>>
      %46 = vector.broadcast %45 : f32 to vector<22x16xf32>
      %47 = arith.mulf %46, %36 : vector<22x16xf32>
      %48 = arith.addf %44, %47 : vector<22x16xf32>
      %c2_58 = arith.constant 2 : index
      %49 = memref.load %arg3[%c2_58] : memref<98xf32, #tpu.memory_space<smem>>
      %50 = vector.broadcast %49 : f32 to vector<22x16xf32>
      %51 = arith.mulf %50, %37 : vector<22x16xf32>
      %52 = arith.addf %48, %51 : vector<22x16xf32>
      %c3_59 = arith.constant 3 : index
      %53 = memref.load %arg3[%c3_59] : memref<98xf32, #tpu.memory_space<smem>>
      %54 = vector.broadcast %53 : f32 to vector<22x16xf32>
      %55 = arith.mulf %54, %38 : vector<22x16xf32>
      %56 = arith.addf %52, %55 : vector<22x16xf32>
      %c4_60 = arith.constant 4 : index
      %57 = memref.load %arg3[%c4_60] : memref<98xf32, #tpu.memory_space<smem>>
      %58 = vector.broadcast %57 : f32 to vector<22x16xf32>
      %59 = arith.mulf %58, %39 : vector<22x16xf32>
      %60 = arith.addf %56, %59 : vector<22x16xf32>
      %c5_61 = arith.constant 5 : index
      %61 = memref.load %arg3[%c5_61] : memref<98xf32, #tpu.memory_space<smem>>
      %62 = vector.broadcast %61 : f32 to vector<22x16xf32>
      %63 = arith.mulf %62, %40 : vector<22x16xf32>
      %64 = arith.addf %60, %63 : vector<22x16xf32>
      %c6_62 = arith.constant 6 : index
      %65 = memref.load %arg3[%c6_62] : memref<98xf32, #tpu.memory_space<smem>>
      %66 = vector.broadcast %65 : f32 to vector<22x16xf32>
      %67 = arith.mulf %66, %41 : vector<22x16xf32>
      %68 = arith.addf %64, %67 : vector<22x16xf32>
      %69 = vector.extract_strided_slice %68 {offsets = [0, 0], sizes = [16, 16], strides = [1, 1]} : vector<22x16xf32> to vector<16x16xf32>
      %70 = arith.addf %34, %69 : vector<16x16xf32>
      %c7 = arith.constant 7 : index
      %71 = memref.load %arg3[%c7] : memref<98xf32, #tpu.memory_space<smem>>
      %72 = vector.broadcast %71 : f32 to vector<22x16xf32>
      %73 = arith.mulf %72, %35 : vector<22x16xf32>
      %c8 = arith.constant 8 : index
      %74 = memref.load %arg3[%c8] : memref<98xf32, #tpu.memory_space<smem>>
      %75 = vector.broadcast %74 : f32 to vector<22x16xf32>
      %76 = arith.mulf %75, %36 : vector<22x16xf32>
      %77 = arith.addf %73, %76 : vector<22x16xf32>
      %c9 = arith.constant 9 : index
      %78 = memref.load %arg3[%c9] : memref<98xf32, #tpu.memory_space<smem>>
      %79 = vector.broadcast %78 : f32 to vector<22x16xf32>
      %80 = arith.mulf %79, %37 : vector<22x16xf32>
      %81 = arith.addf %77, %80 : vector<22x16xf32>
      %c10 = arith.constant 10 : index
      %82 = memref.load %arg3[%c10] : memref<98xf32, #tpu.memory_space<smem>>
      %83 = vector.broadcast %82 : f32 to vector<22x16xf32>
      %84 = arith.mulf %83, %38 : vector<22x16xf32>
      %85 = arith.addf %81, %84 : vector<22x16xf32>
      %c11 = arith.constant 11 : index
      %86 = memref.load %arg3[%c11] : memref<98xf32, #tpu.memory_space<smem>>
      %87 = vector.broadcast %86 : f32 to vector<22x16xf32>
      %88 = arith.mulf %87, %39 : vector<22x16xf32>
      %89 = arith.addf %85, %88 : vector<22x16xf32>
      %c12 = arith.constant 12 : index
      %90 = memref.load %arg3[%c12] : memref<98xf32, #tpu.memory_space<smem>>
      %91 = vector.broadcast %90 : f32 to vector<22x16xf32>
      %92 = arith.mulf %91, %40 : vector<22x16xf32>
      %93 = arith.addf %89, %92 : vector<22x16xf32>
      %c13 = arith.constant 13 : index
      %94 = memref.load %arg3[%c13] : memref<98xf32, #tpu.memory_space<smem>>
      %95 = vector.broadcast %94 : f32 to vector<22x16xf32>
      %96 = arith.mulf %95, %41 : vector<22x16xf32>
      %97 = arith.addf %93, %96 : vector<22x16xf32>
      %98 = vector.extract_strided_slice %97 {offsets = [1, 0], sizes = [16, 16], strides = [1, 1]} : vector<22x16xf32> to vector<16x16xf32>
      %99 = arith.addf %70, %98 : vector<16x16xf32>
      %c14 = arith.constant 14 : index
      %100 = memref.load %arg3[%c14] : memref<98xf32, #tpu.memory_space<smem>>
      %101 = vector.broadcast %100 : f32 to vector<22x16xf32>
      %102 = arith.mulf %101, %35 : vector<22x16xf32>
      %c15 = arith.constant 15 : index
      %103 = memref.load %arg3[%c15] : memref<98xf32, #tpu.memory_space<smem>>
      %104 = vector.broadcast %103 : f32 to vector<22x16xf32>
      %105 = arith.mulf %104, %36 : vector<22x16xf32>
      %106 = arith.addf %102, %105 : vector<22x16xf32>
      %c16 = arith.constant 16 : index
      %107 = memref.load %arg3[%c16] : memref<98xf32, #tpu.memory_space<smem>>
      %108 = vector.broadcast %107 : f32 to vector<22x16xf32>
      %109 = arith.mulf %108, %37 : vector<22x16xf32>
      %110 = arith.addf %106, %109 : vector<22x16xf32>
      %c17 = arith.constant 17 : index
      %111 = memref.load %arg3[%c17] : memref<98xf32, #tpu.memory_space<smem>>
      %112 = vector.broadcast %111 : f32 to vector<22x16xf32>
      %113 = arith.mulf %112, %38 : vector<22x16xf32>
      %114 = arith.addf %110, %113 : vector<22x16xf32>
      %c18 = arith.constant 18 : index
      %115 = memref.load %arg3[%c18] : memref<98xf32, #tpu.memory_space<smem>>
      %116 = vector.broadcast %115 : f32 to vector<22x16xf32>
      %117 = arith.mulf %116, %39 : vector<22x16xf32>
      %118 = arith.addf %114, %117 : vector<22x16xf32>
      %c19_63 = arith.constant 19 : index
      %119 = memref.load %arg3[%c19_63] : memref<98xf32, #tpu.memory_space<smem>>
      %120 = vector.broadcast %119 : f32 to vector<22x16xf32>
      %121 = arith.mulf %120, %40 : vector<22x16xf32>
      %122 = arith.addf %118, %121 : vector<22x16xf32>
      %c20 = arith.constant 20 : index
      %123 = memref.load %arg3[%c20] : memref<98xf32, #tpu.memory_space<smem>>
      %124 = vector.broadcast %123 : f32 to vector<22x16xf32>
      %125 = arith.mulf %124, %41 : vector<22x16xf32>
      %126 = arith.addf %122, %125 : vector<22x16xf32>
      %127 = vector.extract_strided_slice %126 {offsets = [2, 0], sizes = [16, 16], strides = [1, 1]} : vector<22x16xf32> to vector<16x16xf32>
      %128 = arith.addf %99, %127 : vector<16x16xf32>
      %c21 = arith.constant 21 : index
      %129 = memref.load %arg3[%c21] : memref<98xf32, #tpu.memory_space<smem>>
      %130 = vector.broadcast %129 : f32 to vector<22x16xf32>
      %131 = arith.mulf %130, %35 : vector<22x16xf32>
      %c22 = arith.constant 22 : index
      %132 = memref.load %arg3[%c22] : memref<98xf32, #tpu.memory_space<smem>>
      %133 = vector.broadcast %132 : f32 to vector<22x16xf32>
      %134 = arith.mulf %133, %36 : vector<22x16xf32>
      %135 = arith.addf %131, %134 : vector<22x16xf32>
      %c23 = arith.constant 23 : index
      %136 = memref.load %arg3[%c23] : memref<98xf32, #tpu.memory_space<smem>>
      %137 = vector.broadcast %136 : f32 to vector<22x16xf32>
      %138 = arith.mulf %137, %37 : vector<22x16xf32>
      %139 = arith.addf %135, %138 : vector<22x16xf32>
      %c24 = arith.constant 24 : index
      %140 = memref.load %arg3[%c24] : memref<98xf32, #tpu.memory_space<smem>>
      %141 = vector.broadcast %140 : f32 to vector<22x16xf32>
      %142 = arith.mulf %141, %38 : vector<22x16xf32>
      %143 = arith.addf %139, %142 : vector<22x16xf32>
      %c25 = arith.constant 25 : index
      %144 = memref.load %arg3[%c25] : memref<98xf32, #tpu.memory_space<smem>>
      %145 = vector.broadcast %144 : f32 to vector<22x16xf32>
      %146 = arith.mulf %145, %39 : vector<22x16xf32>
      %147 = arith.addf %143, %146 : vector<22x16xf32>
      %c26 = arith.constant 26 : index
      %148 = memref.load %arg3[%c26] : memref<98xf32, #tpu.memory_space<smem>>
      %149 = vector.broadcast %148 : f32 to vector<22x16xf32>
      %150 = arith.mulf %149, %40 : vector<22x16xf32>
      %151 = arith.addf %147, %150 : vector<22x16xf32>
      %c27 = arith.constant 27 : index
      %152 = memref.load %arg3[%c27] : memref<98xf32, #tpu.memory_space<smem>>
      %153 = vector.broadcast %152 : f32 to vector<22x16xf32>
      %154 = arith.mulf %153, %41 : vector<22x16xf32>
      %155 = arith.addf %151, %154 : vector<22x16xf32>
      %156 = vector.extract_strided_slice %155 {offsets = [3, 0], sizes = [16, 16], strides = [1, 1]} : vector<22x16xf32> to vector<16x16xf32>
      %157 = arith.addf %128, %156 : vector<16x16xf32>
      %c28 = arith.constant 28 : index
      %158 = memref.load %arg3[%c28] : memref<98xf32, #tpu.memory_space<smem>>
      %159 = vector.broadcast %158 : f32 to vector<22x16xf32>
      %160 = arith.mulf %159, %35 : vector<22x16xf32>
      %c29 = arith.constant 29 : index
      %161 = memref.load %arg3[%c29] : memref<98xf32, #tpu.memory_space<smem>>
      %162 = vector.broadcast %161 : f32 to vector<22x16xf32>
      %163 = arith.mulf %162, %36 : vector<22x16xf32>
      %164 = arith.addf %160, %163 : vector<22x16xf32>
      %c30 = arith.constant 30 : index
      %165 = memref.load %arg3[%c30] : memref<98xf32, #tpu.memory_space<smem>>
      %166 = vector.broadcast %165 : f32 to vector<22x16xf32>
      %167 = arith.mulf %166, %37 : vector<22x16xf32>
      %168 = arith.addf %164, %167 : vector<22x16xf32>
      %c31 = arith.constant 31 : index
      %169 = memref.load %arg3[%c31] : memref<98xf32, #tpu.memory_space<smem>>
      %170 = vector.broadcast %169 : f32 to vector<22x16xf32>
      %171 = arith.mulf %170, %38 : vector<22x16xf32>
      %172 = arith.addf %168, %171 : vector<22x16xf32>
      %c32 = arith.constant 32 : index
      %173 = memref.load %arg3[%c32] : memref<98xf32, #tpu.memory_space<smem>>
      %174 = vector.broadcast %173 : f32 to vector<22x16xf32>
      %175 = arith.mulf %174, %39 : vector<22x16xf32>
      %176 = arith.addf %172, %175 : vector<22x16xf32>
      %c33 = arith.constant 33 : index
      %177 = memref.load %arg3[%c33] : memref<98xf32, #tpu.memory_space<smem>>
      %178 = vector.broadcast %177 : f32 to vector<22x16xf32>
      %179 = arith.mulf %178, %40 : vector<22x16xf32>
      %180 = arith.addf %176, %179 : vector<22x16xf32>
      %c34 = arith.constant 34 : index
      %181 = memref.load %arg3[%c34] : memref<98xf32, #tpu.memory_space<smem>>
      %182 = vector.broadcast %181 : f32 to vector<22x16xf32>
      %183 = arith.mulf %182, %41 : vector<22x16xf32>
      %184 = arith.addf %180, %183 : vector<22x16xf32>
      %185 = vector.extract_strided_slice %184 {offsets = [4, 0], sizes = [16, 16], strides = [1, 1]} : vector<22x16xf32> to vector<16x16xf32>
      %186 = arith.addf %157, %185 : vector<16x16xf32>
      %c35 = arith.constant 35 : index
      %187 = memref.load %arg3[%c35] : memref<98xf32, #tpu.memory_space<smem>>
      %188 = vector.broadcast %187 : f32 to vector<22x16xf32>
      %189 = arith.mulf %188, %35 : vector<22x16xf32>
      %c36 = arith.constant 36 : index
      %190 = memref.load %arg3[%c36] : memref<98xf32, #tpu.memory_space<smem>>
      %191 = vector.broadcast %190 : f32 to vector<22x16xf32>
      %192 = arith.mulf %191, %36 : vector<22x16xf32>
      %193 = arith.addf %189, %192 : vector<22x16xf32>
      %c37 = arith.constant 37 : index
      %194 = memref.load %arg3[%c37] : memref<98xf32, #tpu.memory_space<smem>>
      %195 = vector.broadcast %194 : f32 to vector<22x16xf32>
      %196 = arith.mulf %195, %37 : vector<22x16xf32>
      %197 = arith.addf %193, %196 : vector<22x16xf32>
      %c38 = arith.constant 38 : index
      %198 = memref.load %arg3[%c38] : memref<98xf32, #tpu.memory_space<smem>>
      %199 = vector.broadcast %198 : f32 to vector<22x16xf32>
      %200 = arith.mulf %199, %38 : vector<22x16xf32>
      %201 = arith.addf %197, %200 : vector<22x16xf32>
      %c39 = arith.constant 39 : index
      %202 = memref.load %arg3[%c39] : memref<98xf32, #tpu.memory_space<smem>>
      %203 = vector.broadcast %202 : f32 to vector<22x16xf32>
      %204 = arith.mulf %203, %39 : vector<22x16xf32>
      %205 = arith.addf %201, %204 : vector<22x16xf32>
      %c40 = arith.constant 40 : index
      %206 = memref.load %arg3[%c40] : memref<98xf32, #tpu.memory_space<smem>>
      %207 = vector.broadcast %206 : f32 to vector<22x16xf32>
      %208 = arith.mulf %207, %40 : vector<22x16xf32>
      %209 = arith.addf %205, %208 : vector<22x16xf32>
      %c41 = arith.constant 41 : index
      %210 = memref.load %arg3[%c41] : memref<98xf32, #tpu.memory_space<smem>>
      %211 = vector.broadcast %210 : f32 to vector<22x16xf32>
      %212 = arith.mulf %211, %41 : vector<22x16xf32>
      %213 = arith.addf %209, %212 : vector<22x16xf32>
      %214 = vector.extract_strided_slice %213 {offsets = [5, 0], sizes = [16, 16], strides = [1, 1]} : vector<22x16xf32> to vector<16x16xf32>
      %215 = arith.addf %186, %214 : vector<16x16xf32>
      %c42 = arith.constant 42 : index
      %216 = memref.load %arg3[%c42] : memref<98xf32, #tpu.memory_space<smem>>
      %217 = vector.broadcast %216 : f32 to vector<22x16xf32>
      %218 = arith.mulf %217, %35 : vector<22x16xf32>
      %c43 = arith.constant 43 : index
      %219 = memref.load %arg3[%c43] : memref<98xf32, #tpu.memory_space<smem>>
      %220 = vector.broadcast %219 : f32 to vector<22x16xf32>
      %221 = arith.mulf %220, %36 : vector<22x16xf32>
      %222 = arith.addf %218, %221 : vector<22x16xf32>
      %c44 = arith.constant 44 : index
      %223 = memref.load %arg3[%c44] : memref<98xf32, #tpu.memory_space<smem>>
      %224 = vector.broadcast %223 : f32 to vector<22x16xf32>
      %225 = arith.mulf %224, %37 : vector<22x16xf32>
      %226 = arith.addf %222, %225 : vector<22x16xf32>
      %c45 = arith.constant 45 : index
      %227 = memref.load %arg3[%c45] : memref<98xf32, #tpu.memory_space<smem>>
      %228 = vector.broadcast %227 : f32 to vector<22x16xf32>
      %229 = arith.mulf %228, %38 : vector<22x16xf32>
      %230 = arith.addf %226, %229 : vector<22x16xf32>
      %c46 = arith.constant 46 : index
      %231 = memref.load %arg3[%c46] : memref<98xf32, #tpu.memory_space<smem>>
      %232 = vector.broadcast %231 : f32 to vector<22x16xf32>
      %233 = arith.mulf %232, %39 : vector<22x16xf32>
      %234 = arith.addf %230, %233 : vector<22x16xf32>
      %c47 = arith.constant 47 : index
      %235 = memref.load %arg3[%c47] : memref<98xf32, #tpu.memory_space<smem>>
      %236 = vector.broadcast %235 : f32 to vector<22x16xf32>
      %237 = arith.mulf %236, %40 : vector<22x16xf32>
      %238 = arith.addf %234, %237 : vector<22x16xf32>
      %c48 = arith.constant 48 : index
      %239 = memref.load %arg3[%c48] : memref<98xf32, #tpu.memory_space<smem>>
      %240 = vector.broadcast %239 : f32 to vector<22x16xf32>
      %241 = arith.mulf %240, %41 : vector<22x16xf32>
      %242 = arith.addf %238, %241 : vector<22x16xf32>
      %243 = vector.extract_strided_slice %242 {offsets = [6, 0], sizes = [16, 16], strides = [1, 1]} : vector<22x16xf32> to vector<16x16xf32>
      %244 = arith.addf %215, %243 : vector<16x16xf32>
      %c0_64 = arith.constant 0 : index
      %c0_65 = arith.constant 0 : index
      %245 = vector.load %arg9[%c0_64, %c0_65] : memref<22x22xf32, #tpu.memory_space<vmem>>, vector<22x16xf32>
      %c0_66 = arith.constant 0 : index
      %c1_67 = arith.constant 1 : index
      %246 = vector.load %arg9[%c0_66, %c1_67] : memref<22x22xf32, #tpu.memory_space<vmem>>, vector<22x16xf32>
      %c0_68 = arith.constant 0 : index
      %c2_69 = arith.constant 2 : index
      %247 = vector.load %arg9[%c0_68, %c2_69] : memref<22x22xf32, #tpu.memory_space<vmem>>, vector<22x16xf32>
      %c0_70 = arith.constant 0 : index
      %c3_71 = arith.constant 3 : index
      %248 = vector.load %arg9[%c0_70, %c3_71] : memref<22x22xf32, #tpu.memory_space<vmem>>, vector<22x16xf32>
      %c0_72 = arith.constant 0 : index
      %c4_73 = arith.constant 4 : index
      %249 = vector.load %arg9[%c0_72, %c4_73] : memref<22x22xf32, #tpu.memory_space<vmem>>, vector<22x16xf32>
      %c0_74 = arith.constant 0 : index
      %c5_75 = arith.constant 5 : index
      %250 = vector.load %arg9[%c0_74, %c5_75] : memref<22x22xf32, #tpu.memory_space<vmem>>, vector<22x16xf32>
      %c0_76 = arith.constant 0 : index
      %c6_77 = arith.constant 6 : index
      %251 = vector.load %arg9[%c0_76, %c6_77] : memref<22x22xf32, #tpu.memory_space<vmem>>, vector<22x16xf32>
      %c49 = arith.constant 49 : index
      %252 = memref.load %arg3[%c49] : memref<98xf32, #tpu.memory_space<smem>>
      %253 = vector.broadcast %252 : f32 to vector<22x16xf32>
      %254 = arith.mulf %253, %245 : vector<22x16xf32>
      %c50 = arith.constant 50 : index
      %255 = memref.load %arg3[%c50] : memref<98xf32, #tpu.memory_space<smem>>
      %256 = vector.broadcast %255 : f32 to vector<22x16xf32>
      %257 = arith.mulf %256, %246 : vector<22x16xf32>
      %258 = arith.addf %254, %257 : vector<22x16xf32>
      %c51 = arith.constant 51 : index
      %259 = memref.load %arg3[%c51] : memref<98xf32, #tpu.memory_space<smem>>
      %260 = vector.broadcast %259 : f32 to vector<22x16xf32>
      %261 = arith.mulf %260, %247 : vector<22x16xf32>
      %262 = arith.addf %258, %261 : vector<22x16xf32>
      %c52 = arith.constant 52 : index
      %263 = memref.load %arg3[%c52] : memref<98xf32, #tpu.memory_space<smem>>
      %264 = vector.broadcast %263 : f32 to vector<22x16xf32>
      %265 = arith.mulf %264, %248 : vector<22x16xf32>
      %266 = arith.addf %262, %265 : vector<22x16xf32>
      %c53 = arith.constant 53 : index
      %267 = memref.load %arg3[%c53] : memref<98xf32, #tpu.memory_space<smem>>
      %268 = vector.broadcast %267 : f32 to vector<22x16xf32>
      %269 = arith.mulf %268, %249 : vector<22x16xf32>
      %270 = arith.addf %266, %269 : vector<22x16xf32>
      %c54 = arith.constant 54 : index
      %271 = memref.load %arg3[%c54] : memref<98xf32, #tpu.memory_space<smem>>
      %272 = vector.broadcast %271 : f32 to vector<22x16xf32>
      %273 = arith.mulf %272, %250 : vector<22x16xf32>
      %274 = arith.addf %270, %273 : vector<22x16xf32>
      %c55 = arith.constant 55 : index
      %275 = memref.load %arg3[%c55] : memref<98xf32, #tpu.memory_space<smem>>
      %276 = vector.broadcast %275 : f32 to vector<22x16xf32>
      %277 = arith.mulf %276, %251 : vector<22x16xf32>
      %278 = arith.addf %274, %277 : vector<22x16xf32>
      %279 = vector.extract_strided_slice %278 {offsets = [0, 0], sizes = [16, 16], strides = [1, 1]} : vector<22x16xf32> to vector<16x16xf32>
      %280 = arith.addf %244, %279 : vector<16x16xf32>
      %c56 = arith.constant 56 : index
      %281 = memref.load %arg3[%c56] : memref<98xf32, #tpu.memory_space<smem>>
      %282 = vector.broadcast %281 : f32 to vector<22x16xf32>
      %283 = arith.mulf %282, %245 : vector<22x16xf32>
      %c57 = arith.constant 57 : index
      %284 = memref.load %arg3[%c57] : memref<98xf32, #tpu.memory_space<smem>>
      %285 = vector.broadcast %284 : f32 to vector<22x16xf32>
      %286 = arith.mulf %285, %246 : vector<22x16xf32>
      %287 = arith.addf %283, %286 : vector<22x16xf32>
      %c58 = arith.constant 58 : index
      %288 = memref.load %arg3[%c58] : memref<98xf32, #tpu.memory_space<smem>>
      %289 = vector.broadcast %288 : f32 to vector<22x16xf32>
      %290 = arith.mulf %289, %247 : vector<22x16xf32>
      %291 = arith.addf %287, %290 : vector<22x16xf32>
      %c59 = arith.constant 59 : index
      %292 = memref.load %arg3[%c59] : memref<98xf32, #tpu.memory_space<smem>>
      %293 = vector.broadcast %292 : f32 to vector<22x16xf32>
      %294 = arith.mulf %293, %248 : vector<22x16xf32>
      %295 = arith.addf %291, %294 : vector<22x16xf32>
      %c60 = arith.constant 60 : index
      %296 = memref.load %arg3[%c60] : memref<98xf32, #tpu.memory_space<smem>>
      %297 = vector.broadcast %296 : f32 to vector<22x16xf32>
      %298 = arith.mulf %297, %249 : vector<22x16xf32>
      %299 = arith.addf %295, %298 : vector<22x16xf32>
      %c61 = arith.constant 61 : index
      %300 = memref.load %arg3[%c61] : memref<98xf32, #tpu.memory_space<smem>>
      %301 = vector.broadcast %300 : f32 to vector<22x16xf32>
      %302 = arith.mulf %301, %250 : vector<22x16xf32>
      %303 = arith.addf %299, %302 : vector<22x16xf32>
      %c62 = arith.constant 62 : index
      %304 = memref.load %arg3[%c62] : memref<98xf32, #tpu.memory_space<smem>>
      %305 = vector.broadcast %304 : f32 to vector<22x16xf32>
      %306 = arith.mulf %305, %251 : vector<22x16xf32>
      %307 = arith.addf %303, %306 : vector<22x16xf32>
      %308 = vector.extract_strided_slice %307 {offsets = [1, 0], sizes = [16, 16], strides = [1, 1]} : vector<22x16xf32> to vector<16x16xf32>
      %309 = arith.addf %280, %308 : vector<16x16xf32>
      %c63 = arith.constant 63 : index
      %310 = memref.load %arg3[%c63] : memref<98xf32, #tpu.memory_space<smem>>
      %311 = vector.broadcast %310 : f32 to vector<22x16xf32>
      %312 = arith.mulf %311, %245 : vector<22x16xf32>
      %c64 = arith.constant 64 : index
      %313 = memref.load %arg3[%c64] : memref<98xf32, #tpu.memory_space<smem>>
      %314 = vector.broadcast %313 : f32 to vector<22x16xf32>
      %315 = arith.mulf %314, %246 : vector<22x16xf32>
      %316 = arith.addf %312, %315 : vector<22x16xf32>
      %c65 = arith.constant 65 : index
      %317 = memref.load %arg3[%c65] : memref<98xf32, #tpu.memory_space<smem>>
      %318 = vector.broadcast %317 : f32 to vector<22x16xf32>
      %319 = arith.mulf %318, %247 : vector<22x16xf32>
      %320 = arith.addf %316, %319 : vector<22x16xf32>
      %c66 = arith.constant 66 : index
      %321 = memref.load %arg3[%c66] : memref<98xf32, #tpu.memory_space<smem>>
      %322 = vector.broadcast %321 : f32 to vector<22x16xf32>
      %323 = arith.mulf %322, %248 : vector<22x16xf32>
      %324 = arith.addf %320, %323 : vector<22x16xf32>
      %c67 = arith.constant 67 : index
      %325 = memref.load %arg3[%c67] : memref<98xf32, #tpu.memory_space<smem>>
      %326 = vector.broadcast %325 : f32 to vector<22x16xf32>
      %327 = arith.mulf %326, %249 : vector<22x16xf32>
      %328 = arith.addf %324, %327 : vector<22x16xf32>
      %c68 = arith.constant 68 : index
      %329 = memref.load %arg3[%c68] : memref<98xf32, #tpu.memory_space<smem>>
      %330 = vector.broadcast %329 : f32 to vector<22x16xf32>
      %331 = arith.mulf %330, %250 : vector<22x16xf32>
      %332 = arith.addf %328, %331 : vector<22x16xf32>
      %c69 = arith.constant 69 : index
      %333 = memref.load %arg3[%c69] : memref<98xf32, #tpu.memory_space<smem>>
      %334 = vector.broadcast %333 : f32 to vector<22x16xf32>
      %335 = arith.mulf %334, %251 : vector<22x16xf32>
      %336 = arith.addf %332, %335 : vector<22x16xf32>
      %337 = vector.extract_strided_slice %336 {offsets = [2, 0], sizes = [16, 16], strides = [1, 1]} : vector<22x16xf32> to vector<16x16xf32>
      %338 = arith.addf %309, %337 : vector<16x16xf32>
      %c70 = arith.constant 70 : index
      %339 = memref.load %arg3[%c70] : memref<98xf32, #tpu.memory_space<smem>>
      %340 = vector.broadcast %339 : f32 to vector<22x16xf32>
      %341 = arith.mulf %340, %245 : vector<22x16xf32>
      %c71 = arith.constant 71 : index
      %342 = memref.load %arg3[%c71] : memref<98xf32, #tpu.memory_space<smem>>
      %343 = vector.broadcast %342 : f32 to vector<22x16xf32>
      %344 = arith.mulf %343, %246 : vector<22x16xf32>
      %345 = arith.addf %341, %344 : vector<22x16xf32>
      %c72 = arith.constant 72 : index
      %346 = memref.load %arg3[%c72] : memref<98xf32, #tpu.memory_space<smem>>
      %347 = vector.broadcast %346 : f32 to vector<22x16xf32>
      %348 = arith.mulf %347, %247 : vector<22x16xf32>
      %349 = arith.addf %345, %348 : vector<22x16xf32>
      %c73 = arith.constant 73 : index
      %350 = memref.load %arg3[%c73] : memref<98xf32, #tpu.memory_space<smem>>
      %351 = vector.broadcast %350 : f32 to vector<22x16xf32>
      %352 = arith.mulf %351, %248 : vector<22x16xf32>
      %353 = arith.addf %349, %352 : vector<22x16xf32>
      %c74 = arith.constant 74 : index
      %354 = memref.load %arg3[%c74] : memref<98xf32, #tpu.memory_space<smem>>
      %355 = vector.broadcast %354 : f32 to vector<22x16xf32>
      %356 = arith.mulf %355, %249 : vector<22x16xf32>
      %357 = arith.addf %353, %356 : vector<22x16xf32>
      %c75 = arith.constant 75 : index
      %358 = memref.load %arg3[%c75] : memref<98xf32, #tpu.memory_space<smem>>
      %359 = vector.broadcast %358 : f32 to vector<22x16xf32>
      %360 = arith.mulf %359, %250 : vector<22x16xf32>
      %361 = arith.addf %357, %360 : vector<22x16xf32>
      %c76 = arith.constant 76 : index
      %362 = memref.load %arg3[%c76] : memref<98xf32, #tpu.memory_space<smem>>
      %363 = vector.broadcast %362 : f32 to vector<22x16xf32>
      %364 = arith.mulf %363, %251 : vector<22x16xf32>
      %365 = arith.addf %361, %364 : vector<22x16xf32>
      %366 = vector.extract_strided_slice %365 {offsets = [3, 0], sizes = [16, 16], strides = [1, 1]} : vector<22x16xf32> to vector<16x16xf32>
      %367 = arith.addf %338, %366 : vector<16x16xf32>
      %c77 = arith.constant 77 : index
      %368 = memref.load %arg3[%c77] : memref<98xf32, #tpu.memory_space<smem>>
      %369 = vector.broadcast %368 : f32 to vector<22x16xf32>
      %370 = arith.mulf %369, %245 : vector<22x16xf32>
      %c78 = arith.constant 78 : index
      %371 = memref.load %arg3[%c78] : memref<98xf32, #tpu.memory_space<smem>>
      %372 = vector.broadcast %371 : f32 to vector<22x16xf32>
      %373 = arith.mulf %372, %246 : vector<22x16xf32>
      %374 = arith.addf %370, %373 : vector<22x16xf32>
      %c79 = arith.constant 79 : index
      %375 = memref.load %arg3[%c79] : memref<98xf32, #tpu.memory_space<smem>>
      %376 = vector.broadcast %375 : f32 to vector<22x16xf32>
      %377 = arith.mulf %376, %247 : vector<22x16xf32>
      %378 = arith.addf %374, %377 : vector<22x16xf32>
      %c80 = arith.constant 80 : index
      %379 = memref.load %arg3[%c80] : memref<98xf32, #tpu.memory_space<smem>>
      %380 = vector.broadcast %379 : f32 to vector<22x16xf32>
      %381 = arith.mulf %380, %248 : vector<22x16xf32>
      %382 = arith.addf %378, %381 : vector<22x16xf32>
      %c81 = arith.constant 81 : index
      %383 = memref.load %arg3[%c81] : memref<98xf32, #tpu.memory_space<smem>>
      %384 = vector.broadcast %383 : f32 to vector<22x16xf32>
      %385 = arith.mulf %384, %249 : vector<22x16xf32>
      %386 = arith.addf %382, %385 : vector<22x16xf32>
      %c82 = arith.constant 82 : index
      %387 = memref.load %arg3[%c82] : memref<98xf32, #tpu.memory_space<smem>>
      %388 = vector.broadcast %387 : f32 to vector<22x16xf32>
      %389 = arith.mulf %388, %250 : vector<22x16xf32>
      %390 = arith.addf %386, %389 : vector<22x16xf32>
      %c83 = arith.constant 83 : index
      %391 = memref.load %arg3[%c83] : memref<98xf32, #tpu.memory_space<smem>>
      %392 = vector.broadcast %391 : f32 to vector<22x16xf32>
      %393 = arith.mulf %392, %251 : vector<22x16xf32>
      %394 = arith.addf %390, %393 : vector<22x16xf32>
      %395 = vector.extract_strided_slice %394 {offsets = [4, 0], sizes = [16, 16], strides = [1, 1]} : vector<22x16xf32> to vector<16x16xf32>
      %396 = arith.addf %367, %395 : vector<16x16xf32>
      %c84 = arith.constant 84 : index
      %397 = memref.load %arg3[%c84] : memref<98xf32, #tpu.memory_space<smem>>
      %398 = vector.broadcast %397 : f32 to vector<22x16xf32>
      %399 = arith.mulf %398, %245 : vector<22x16xf32>
      %c85 = arith.constant 85 : index
      %400 = memref.load %arg3[%c85] : memref<98xf32, #tpu.memory_space<smem>>
      %401 = vector.broadcast %400 : f32 to vector<22x16xf32>
      %402 = arith.mulf %401, %246 : vector<22x16xf32>
      %403 = arith.addf %399, %402 : vector<22x16xf32>
      %c86 = arith.constant 86 : index
      %404 = memref.load %arg3[%c86] : memref<98xf32, #tpu.memory_space<smem>>
      %405 = vector.broadcast %404 : f32 to vector<22x16xf32>
      %406 = arith.mulf %405, %247 : vector<22x16xf32>
      %407 = arith.addf %403, %406 : vector<22x16xf32>
      %c87 = arith.constant 87 : index
      %408 = memref.load %arg3[%c87] : memref<98xf32, #tpu.memory_space<smem>>
      %409 = vector.broadcast %408 : f32 to vector<22x16xf32>
      %410 = arith.mulf %409, %248 : vector<22x16xf32>
      %411 = arith.addf %407, %410 : vector<22x16xf32>
      %c88 = arith.constant 88 : index
      %412 = memref.load %arg3[%c88] : memref<98xf32, #tpu.memory_space<smem>>
      %413 = vector.broadcast %412 : f32 to vector<22x16xf32>
      %414 = arith.mulf %413, %249 : vector<22x16xf32>
      %415 = arith.addf %411, %414 : vector<22x16xf32>
      %c89 = arith.constant 89 : index
      %416 = memref.load %arg3[%c89] : memref<98xf32, #tpu.memory_space<smem>>
      %417 = vector.broadcast %416 : f32 to vector<22x16xf32>
      %418 = arith.mulf %417, %250 : vector<22x16xf32>
      %419 = arith.addf %415, %418 : vector<22x16xf32>
      %c90 = arith.constant 90 : index
      %420 = memref.load %arg3[%c90] : memref<98xf32, #tpu.memory_space<smem>>
      %421 = vector.broadcast %420 : f32 to vector<22x16xf32>
      %422 = arith.mulf %421, %251 : vector<22x16xf32>
      %423 = arith.addf %419, %422 : vector<22x16xf32>
      %424 = vector.extract_strided_slice %423 {offsets = [5, 0], sizes = [16, 16], strides = [1, 1]} : vector<22x16xf32> to vector<16x16xf32>
      %425 = arith.addf %396, %424 : vector<16x16xf32>
      %c91 = arith.constant 91 : index
      %426 = memref.load %arg3[%c91] : memref<98xf32, #tpu.memory_space<smem>>
      %427 = vector.broadcast %426 : f32 to vector<22x16xf32>
      %428 = arith.mulf %427, %245 : vector<22x16xf32>
      %c92 = arith.constant 92 : index
      %429 = memref.load %arg3[%c92] : memref<98xf32, #tpu.memory_space<smem>>
      %430 = vector.broadcast %429 : f32 to vector<22x16xf32>
      %431 = arith.mulf %430, %246 : vector<22x16xf32>
      %432 = arith.addf %428, %431 : vector<22x16xf32>
      %c93 = arith.constant 93 : index
      %433 = memref.load %arg3[%c93] : memref<98xf32, #tpu.memory_space<smem>>
      %434 = vector.broadcast %433 : f32 to vector<22x16xf32>
      %435 = arith.mulf %434, %247 : vector<22x16xf32>
      %436 = arith.addf %432, %435 : vector<22x16xf32>
      %c94 = arith.constant 94 : index
      %437 = memref.load %arg3[%c94] : memref<98xf32, #tpu.memory_space<smem>>
      %438 = vector.broadcast %437 : f32 to vector<22x16xf32>
      %439 = arith.mulf %438, %248 : vector<22x16xf32>
      %440 = arith.addf %436, %439 : vector<22x16xf32>
      %c95 = arith.constant 95 : index
      %441 = memref.load %arg3[%c95] : memref<98xf32, #tpu.memory_space<smem>>
      %442 = vector.broadcast %441 : f32 to vector<22x16xf32>
      %443 = arith.mulf %442, %249 : vector<22x16xf32>
      %444 = arith.addf %440, %443 : vector<22x16xf32>
      %c96 = arith.constant 96 : index
      %445 = memref.load %arg3[%c96] : memref<98xf32, #tpu.memory_space<smem>>
      %446 = vector.broadcast %445 : f32 to vector<22x16xf32>
      %447 = arith.mulf %446, %250 : vector<22x16xf32>
      %448 = arith.addf %444, %447 : vector<22x16xf32>
      %c97 = arith.constant 97 : index
      %449 = memref.load %arg3[%c97] : memref<98xf32, #tpu.memory_space<smem>>
      %450 = vector.broadcast %449 : f32 to vector<22x16xf32>
      %451 = arith.mulf %450, %251 : vector<22x16xf32>
      %452 = arith.addf %448, %451 : vector<22x16xf32>
      %453 = vector.extract_strided_slice %452 {offsets = [6, 0], sizes = [16, 16], strides = [1, 1]} : vector<22x16xf32> to vector<16x16xf32>
      %454 = arith.addf %425, %453 : vector<16x16xf32>
      %455 = arith.negf %454 : vector<16x16xf32>
      %456 = math.exp %455 : vector<16x16xf32>
      %cst_78 = arith.constant 1.000000e+00 : f32
      %457 = vector.broadcast %cst_78 : f32 to vector<16x16xf32>
      %458 = arith.addf %457, %456 : vector<16x16xf32>
      %459 = arith.divf %457, %458 : vector<16x16xf32>
      %c0_79 = arith.constant 0 : index
      %c0_80 = arith.constant 0 : index
      %c0_81 = arith.constant 0 : index
      %460 = vector.load %arg5[%c0_79, %c0_80, %c0_81] : memref<1x16x16xf32, #tpu.memory_space<vmem>>, vector<1x16x16xf32>
      %461 = vector.shape_cast %460 : vector<1x16x16xf32> to vector<16x16xf32>
      %462 = vector.shape_cast %459 : vector<16x16xf32> to vector<1x16x16xf32>
      tpu.vector_store %arg5[%c0_79, %c0_80, %c0_81], %462 {strides = array<i32>} : memref<1x16x16xf32, #tpu.memory_space<vmem>>, vector<1x16x16xf32>,
    } else {
    }
    return
  }
  func.func @transform_0(%arg0: i32, %arg1: i32) -> (i32, i32, i32, i32) {
    %c0_i32 = arith.constant 0 : i32
    %c0_i32_0 = arith.constant 0 : i32
    %c0_i32_1 = arith.constant 0 : i32
    return %arg0, %arg1, %c0_i32, %c0_i32_0 : i32, i32, i32, i32
  }
  func.func @transform_1(%arg0: i32, %arg1: i32) -> i32 {
    %c0_i32 = arith.constant 0 : i32
    %c0_i32_0 = arith.constant 0 : i32
    return %c0_i32 : i32
  }
  func.func @transform_2(%arg0: i32, %arg1: i32) -> i32 {
    %c0_i32 = arith.constant 0 : i32
    %c0_i32_0 = arith.constant 0 : i32
    return %c0_i32 : i32
  }
  func.func @transform_3(%arg0: i32, %arg1: i32) -> (i32, i32, i32) {
    %c0_i32 = arith.constant 0 : i32
    %c0_i32_0 = arith.constant 0 : i32
    %c0_i32_1 = arith.constant 0 : i32
    return %arg0, %c0_i32, %c0_i32_0 : i32, i32, i32
  }
}

</mosaic_0001>

<bundles_post_ra>
// kernel: tpu_custom_call.1
= control target key start
LH: loop header
LB: loop body
LE: loop exit
PB: predicated region body
PF: predicated region fallthrough
CT: control target
= control target key end

     0   :  { %s3607_s0 = inlined_call_operand.hbm [shape: f32[2,4,16,16], index: 0, kind: input, shape index: {}]   ;;  %s3608_s1 = inlined_call_operand.vmem [shape: f32[98], index: 1, kind: input, shape index: {}]   ;;  %s3609_s2 = inlined_call_operand.<no memory space> [shape: f32[1], index: 2, kind: input, shape index: {}]   ;;  %s3610_s3 = inlined_call_operand.hbm [shape: f32[2,16,16], index: 3, kind: output, shape index: {}]  }
   0x1   :  { %8 = sst [smem:[#allocation6]] %s3609_s2 }
   0x2   :  { %9 = vsyncpa [#allocation8], 0 }
   0x3   :  { %11 = vsyncpa [#allocation8 + $0x1], 0 }
   0x4   :  { %12 = vsyncpa [#allocation10], 0 }
   0x5   :  { %13 = vsyncpa [#allocation9], 0 }
   0x6   :  { %15 = vsyncpa [#allocation9 + $0x1], 0  ;;  %s2705_s14 = smov 0   ;;  %s2707_s15 = smov 0  }
   0x7   :  { %s2709_s16 = smov 0   ;;  %s2711_s17 = smov 0  }
   0x8   :  { %s2713_s18 = smov 0   ;;  %s2715_s19 = smov 0  }
   0x9 LB: > { %s2317_s2 = sadd.s32 4294967295, %s2666_s19   ;;  %s2318_s20 = sadd.s32 4294967294, %s2666_s19   ;;  %s2666_s19 = sphi %s2715_s19, %s21_s19   ;;  %s2662_s18 = sphi %s2713_s18, %s3622_s18   ;;  %s2658_s17 = sphi %s2711_s17, %s3621_s17   ;;  %s2654_s16 = sphi %s2709_s16, %s3620_s16   ;;  %s2650_s15 = sphi %s2707_s15, %s3619_s15   ;;  %s2646_s14 = sphi %s2705_s14, %s3618_s14  }
   0xa   : > { %s42_s21 = sadd.s32 1, %s2654_s16  ;;  %p49_p0 = scmp.ne.s32.totalorder %s2654_s16, %s2650_s15 }
   0xb   : > { %p50_p1 = scmp.eq.s32.totalorder %s2666_s19, 0  ;;  %p55_p2 = scmp.ne.s32.totalorder %s2650_s15, %s2646_s14 }
   0xc   : > { %p2743_p3 = scmp.eq.s32.totalorder %s2317_s2, 0  ;;  %p121_p4 = scmp.eq.s32.totalorder %s2317_s2, 1 }
   0xd   : > { %p2747_p5 = por %p50_p1, %p49_p0  ;;  %p127_p6 = scmp.eq.s32.totalorder %s2318_s20, 1 }
   0xe   : > { %p2753_p7 = por %p2743_p3, %p55_p2  ;;  %p2757_p8 = por %p121_p4, %p49_p0 }
   0xf   : > { %p2761_p9 = por %p127_p6, %p55_p2  ;;  %p2319_p10 = scmp.ge.s32.totalorder %s2666_s19, 1 }
  0x10   : > { %p134_p11 = scmp.lt.s32.totalorder %s2666_s19, 3  ;;  %s146_s29 = sshll.u32 %s3608_s1, 4  ;;  %s147_s29 = int_to_ptr.vmem [resolvable:$true] %s146_s29 }
  0x11   : > { %p2321_p13 = scmp.ge.s32.totalorder %s2666_s19, 2  ;;  %p2456_p0 = scmp.lt.s32.totalorder %s2666_s19, 2 }
  0x12   : > { %p2770_p12 = pnand %p2319_p10, %p134_p11  ;;  %s33_s5 = sadd.s32 1, %s2662_s18 }
  0x13   : > { %p2780_p2 = pnand %p2456_p0, %p2747_p5  ;;  %p35_p6 = scmp.ge.s32.totalorder %s33_s5, 2 }
  0x14   : > { %p2443_p1 = pneg %p2770_p12  ;;  %s160_s6 = sand.u32 1, %s2654_s16  }
  0x15   : > { %s2668_s7 = smov [#allocation11]   ;;  %s3624_s5 = smov (%p35_p6, %s33_s5), 0 }
  0x16   : > { %p2444_p4 = pnand %p2443_p1, %p2743_p3  ;;  %s2322_s8 = sshll.u32 %s160_s6, 6 }
  0x17   : > { %s37_s9 = ssub.s32 %s2662_s18, %s3624_s5  ;;  %s2433_s10 = sshll.u32 %s2662_s18, 6 }
  0x18   : > { %2446 = dma.vmem_to_smem (!%p2444_p4), %s147_s29, 16, %s2668_s7, [#allocation10]  }
  0x19   : > { %p40_p10 = scmp.eq.s32.totalorder %s37_s9, 0  ;;  %s172_s13 = scalar_lea.hbm %s3607_s0, %s2433_s10 }
  0x1a   : > { %s164_s2 = scalar_lea.vmem [#allocation7], %s2322_s8  ;;  %s173_s27 = sshll.u32 %s172_s13, 4  ;;  %s174_s27 = int_to_ptr.hbm [resolvable:$true] %s173_s27 }
  0x1b   : > { %s175_s20 = sshll.u32 %s164_s2, 4  ;;  %s161_s28 = scalar_lea.sflag [#allocation8], %s160_s6  ;;  %s176_s20 = int_to_ptr.vmem [resolvable:$true] %s175_s20 }
  0x1c   : > { %s2799_s23 = scalar_select %p40_p10, %s2654_s16, %s42_s21  }
  0x1d   : > { %s2669_s29 = smov 128   ;;  %s2670_s7 = smov 8  }
  0x1e   : > { %2450 = dma.hbm_to_vmem [thread:$0]  (!%p2780_p2), %s174_s27, 1024, %s176_s20, %s161_s28, %s2669_s29, %s2669_s29, %s2670_s7  }
  0x1f   : > { %187 = sbr.rel (%p2770_p12) target bundleno = 974 (0x3ce), region = 32  ;;  %s2806_s9 = sand.u32 (!%p2770_p12), 1, %s2650_s15  }
  0x20   : > { %s2326_s8 = sshll.u32 (!%p2770_p12), %s2806_s9, 6  ;;  %s190_s21 = scalar_lea.sflag (!%p2770_p12), [#allocation8], %s2806_s9 }
  0x21   : > { %s193_s10 = scalar_lea.vmem (!%p2770_p12), [#allocation7], %s2326_s8 }
  0x24   : > { %2633 = dma.done.wait (%p2753_p7), %s190_s21, 1024  }
  0x25   : > { %2635 = vsyncadd (%p2753_p7), %s190_s21, 4294966272 }
  0x26   : > { %2637 = dma.done.wait (%p2743_p3), [#allocation10], 16  }
  0x27   : > { %2639 = vsyncadd (%p2743_p3), [#allocation10], 4294967280 }
  0x28   : > { %204 = sfence }
  0x29   : > { %vm228_vm0 = vcmask 130048   ;;  %v233_v0 = vld [vmem:[%s193_s10] sm:$0xff]  ;;  %v235_v1 = vld [vmem:[%s193_s10 + $0x10] sm:$0xff]  ;;  %vm285_vm1 = vcmask 174080   ;;  %v2671_v3 = vmov 0.0   ;;  %v234_v10 = vld [vmem:[%s193_s10 + $0x8] sm:$0xff] }
  0x2a   : > { %v237_v2 = vld [vmem:[%s193_s10 + $0x20] sm:$0xff]  ;;  %229 = vst.msk [vmem:[#allocation2] sm:$0xff] %vm228_vm0, %v2671_v3  ;;  %v239_v4 = vld [vmem:[%s193_s10 + $0x30] sm:$0xff]  ;;  %v244_v5 = vsel %vm228_vm0, %v233_v0, 0.0  ;;  %v245_v6 = vsel %vm228_vm0, %v235_v1, 0.0  ;;  %v236_v11 = vld [vmem:[%s193_s10 + $0x18] sm:$0xff] }
  0x2b   : > { %v247_v7 = vsel %vm228_vm0, %v237_v2, 0.0  ;;  %v246_v8 = vadd.f32 %v245_v6, %v244_v5  ;;  %v249_v9 = vsel %vm228_vm0, %v239_v4, 0.0  ;;  %286 = vst.msk [vmem:[#allocation4] sm:$0x7] %vm285_vm1, %v2671_v3  ;;  %v238_v12 = vld [vmem:[%s193_s10 + $0x28] sm:$0xff]  ;;  %v240_v13 = vld [vmem:[%s193_s10 + $0x38] sm:$0xff] }
  0x2c   : > { %287 = vst.msk [vmem:[#allocation4 + $0x13] sm:$0x7] %vm285_vm1, %v2671_v3  ;;  %v251_v14 = vsel %vm228_vm0, %v234_v10, 0.0  ;;  %v252_v15 = vsel %vm228_vm0, %v236_v11, 0.0  ;;  %v254_v16 = vsel %vm228_vm0, %v238_v12, 0.0  ;;  %v264_v19 = vsel %vm228_vm0, %v233_v0, -inf }
  0x2d   : > { %v248_v17 = vadd.f32 %v247_v7, %v246_v8  ;;  %294 = vst.msk [vmem:[#allocation5] sm:$0x7] %vm285_vm1, %v2671_v3  ;;  %v253_v18 = vadd.f32 %v252_v15, %v251_v14  ;;  %v265_v20 = vsel %vm228_vm0, %v235_v1, -inf  ;;  %v266_v21 = vsel %vm228_vm0, %v237_v2, -inf  ;;  %s2673_s22 = smov 3   ;;  %s2330_s24 = sld [smem:[#allocation11 + $0x2]] }
  0x2e   : > { %295 = vst.msk [vmem:[#allocation5 + $0x13] sm:$0x7] %vm285_vm1, %v2671_v3  ;;  %v268_v22 = vsel %vm228_vm0, %v239_v4, -inf  ;;  %v256_v25 = vsel %vm228_vm0, %v240_v13, 0.0  ;;  %v2672_v26 = vmov -inf   ;;  %v267_v27 = vmax.f32 %v264_v19, %v266_v21  ;;  %s2329_s30 = sld [smem:[#allocation11 + $0x1]] }
  0x2f   : > { %v250_v23 = vadd.f32 %v249_v9, %v248_v17  ;;  %230 = vst.msk [vmem:[#allocation2 + $0x8] sm:$0xff] %vm228_vm0, %v2671_v3  ;;  %v255_v24 = vadd.f32 %v254_v16, %v253_v18  ;;  %v269_v28 = vmax.f32 %v265_v20, %v268_v22  ;;  %vm288_vm2 = vcmask 23552   ;;  %s2331_s4 = sld [smem:[#allocation11 + $0x3]]  ;;  %s2674_s6 = smov 126  }
  0x30   : > { %231 = vst.msk [vmem:[#allocation3] sm:$0xff] %vm228_vm0, %v2672_v26  ;;  %vm291_vm3 = vcmask 179352   ;;  %v271_v42 = vsel %vm228_vm0, %v234_v10, -inf  ;;  %v272_v43 = vsel %vm228_vm0, %v236_v11, -inf  ;;  %v273_v44 = vsel %vm228_vm0, %v238_v12, -inf  ;;  %s2675_s11 = smov 127  }
  0x31   : > { %v241_v29 = vld [vmem:[#allocation2] sm:$0xff]  ;;  %232 = vst.msk [vmem:[#allocation3 + $0x8] sm:$0xff] %vm228_vm0, %v2672_v26  ;;  %v257_v31 = vadd.f32 %v256_v25, %v255_v24  ;;  %v270_v32 = vmax.f32 %v267_v27, %v269_v28  ;;  %v275_v45 = vsel %vm228_vm0, %v240_v13, -inf  ;;  %v274_v46 = vmax.f32 %v271_v42, %v273_v44  ;;  %s2333_s12 = sld [smem:[#allocation11 + $0x5]]  ;;  %s2676_s2 = smov 125  }
  0x32   : > { %v258_v30 = vadd.f32 %v250_v23, %v241_v29  ;;  %289 = vst.msk [vmem:[#allocation4 + $0x3] sm:$0xff] %vm288_vm2, %v2671_v3  ;;  %v276_v47 = vmax.f32 %v272_v43, %v275_v45  ;;  %vm313_vm4 = vcmask 154648   ;;  %s2332_s13 = sld [smem:[#allocation11 + $0x4]]  ;;  %s2677_s27 = smov 123   ;;  %vm550_vm5 = vcmask 1046528  }
  0x33   : > { %292 = vst.msk [vmem:[#allocation4 + $0x3] sm:$0xff] %vm291_vm3, %v2671_v3  ;;  %v351_v53 = vstv %s2330_s24  ;;  %s2334_s20 = sld [smem:[#allocation11 + $0x6]]  ;;  %s2678_s28 = smov 124   ;;  %vm688_vm6 = vcmask 1045504   ;;  %vm826_vm7 = vcmask 1044480   ;;  %vm964_vm8 = vcmask 1043456  }
  0x34   : > { %260 = vst.msk [vmem:[#allocation2] sm:$0xff] %vm228_vm0, %v258_v30  ;;  %v277_v48 = vmax.f32 %v274_v46, %v276_v47  ;;  %v337_v54 = vstv %s2329_s30  ;;  %s2336_s29 = sld [smem:[#allocation11 + $0x8]]  ;;  %s2679_s7 = smov 122   ;;  %vm1102_vm9 = vcmask 1042432   ;;  %vm1240_vm10 = vcmask 1041408  }
  0x35   : > { %290 = vst.msk [vmem:[#allocation4 + $0xb] sm:$0xff] %vm288_vm2, %v2671_v3  ;;  %v365_v60 = vstv %s2331_s4  ;;  %s2337_s8 = sld [smem:[#allocation11 + $0x9]] }
  0x36   : > { %v242_v33 = vld [vmem:[#allocation2 + $0x8] sm:$0xff]  ;;  %296 = vst.msk [vmem:[#allocation5 + $0x3] sm:$0xff] %vm288_vm2, %v2671_v3  ;;  %s2338_s21 = sld [smem:[#allocation11 + $0xa]] }
  0x37   : > { %v259_v34 = vadd.f32 %v257_v31, %v242_v33  ;;  %v262_v35 = vld [vmem:[#allocation3] sm:$0xff]  ;;  %297 = vst.msk [vmem:[#allocation5 + $0xb] sm:$0xff] %vm288_vm2, %v2671_v3  ;;  %v393_v0 = vstv %s2333_s12  ;;  %s2339_s10 = sld [smem:[#allocation11 + $0xb]] }
  0x38   : > { %v278_v36 = vmax.f32 %v262_v35, %v270_v32  ;;  %293 = vst.msk [vmem:[#allocation4 + $0xb] sm:$0xff] %vm291_vm3, %v2671_v3  ;;  %v263_v49 = vld [vmem:[#allocation3 + $0x8] sm:$0xff]  ;;  %v379_v1 = vstv %s2332_s13  ;;  %s2341_s24 = sld [smem:[#allocation11 + $0xd]] }
  0x39   : > { %261 = vst.msk [vmem:[#allocation2 + $0x8] sm:$0xff] %vm228_vm0, %v259_v34  ;;  %v279_v50 = vmax.f32 %v263_v49, %v277_v48  ;;  %v407_v5 = vstv %s2334_s20  ;;  %s2343_s30 = sld [smem:[#allocation11 + $0xf]] }
  0x3a   : > { %280 = vst.msk [vmem:[#allocation3] sm:$0xff] %vm228_vm0, %v278_v36  ;;  %v428_v10 = vstv %s2336_s29  ;;  %s2344_s4 = sld [smem:[#allocation11 + $0x10]] }
  0x3b   : > { %v301_v37 = vld [vmem:[#allocation2] sm:$0xff]  ;;  %298 = vst.msk [vmem:[#allocation5 + $0x3] sm:$0xff] %vm291_vm3, %v2671_v3  ;;  %v448_v14 = vstv %s2337_s8  ;;  %s2345_s12 = sld [smem:[#allocation11 + $0x11]] }
  0x3c   : > { %v303_v38 = vmul.f32 0.25, %v301_v37  ;;  %299 = vst.msk [vmem:[#allocation5 + $0xb] sm:$0xff] %vm291_vm3, %v2671_v3  ;;  %v468_v18 = vstv %s2338_s21  ;;  %s2346_s13 = sld [smem:[#allocation11 + $0x12]] }
  0x3d   : > { %281 = vst.msk [vmem:[#allocation3 + $0x8] sm:$0xff] %vm228_vm0, %v279_v50  ;;  %v488_v22 = vstv %s2339_s10  ;;  %s2347_s20 = sld [smem:[#allocation11 + $0x13]] }
  0x3e   : > { %307 = vrot.lane.b32.xlu0 %v303_v38, %s2673_s22  ;;  %v528_v31 = vstv %s2341_s24  ;;  %s2348_s29 = sld [smem:[#allocation11 + $0x14]] }
  0x3f   : > { %v566_v36 = vstv %s2343_s30  ;;  %s2350_s8 = sld [smem:[#allocation11 + $0x16]] }
  0x40   : > { %v302_v39 = vld [vmem:[#allocation2 + $0x8] sm:$0xff]  ;;  %s2351_s21 = sld [smem:[#allocation11 + $0x17]] }
  0x41   : > { %v316_v40 = vld [vmem:[#allocation3] sm:$0xff]  ;;  %v304_v41 = vmul.f32 0.25, %v302_v39  ;;  %v606_v45 = vstv %s2345_s12  ;;  %s2352_s10 = sld [smem:[#allocation11 + $0x18]] }
  0x42   : > { %320 = vrot.lane.b32.xlu1 %v316_v40, %s2673_s22  ;;  %v586_v40 = vstv %s2344_s4  ;;  %v626_v50 = vstv %s2346_s13  ;;  %s2354_s24 = sld [smem:[#allocation11 + $0x1a]] }
  0x43   : > { %s2355_s30 = sld [smem:[#allocation11 + $0x1b]] }
  0x44   : > { %v317_v51 = vld [vmem:[#allocation3 + $0x8] sm:$0xff]  ;;  %s332_s4 = sld [smem:[#allocation11]] }
  0x45   : > { %s2357_s12 = sld [smem:[#allocation11 + $0x1d]] }
  0x46   : > { %309 = vrot.lane.b32.xlu0 %v304_v41, %s2673_s22  ;;  %s2335_s13 = sld [smem:[#allocation11 + $0x7]] }
  0x4a   : > { %322 = vrot.lane.b32.xlu1 %v317_v51, %s2673_s22  ;;  %s2340_s22 = sld [smem:[#allocation11 + $0xc]] }
  0x50   : > { %v508_v26 = vstv %s2340_s22  ;;  %s2353_s22 = sld [smem:[#allocation11 + $0x19]] }
  0xb0   : > { %v308_v52 = vpop.permute.xlu0 %307 }
  0xb1   : > { %314 = vst.msk [vmem:[#allocation4 + $0x3] sm:$0xff] %vm313_vm4, %v308_v52 }
  0xb4   : > { %v321_v30 = vpop.permute.xlu1 %320 }
  0xb5   : > { %326 = vst.msk [vmem:[#allocation5 + $0x3] sm:$0xff] %vm313_vm4, %v321_v30 }
  0xb8   : > { %v2851_v55 = vld [vmem:[#allocation4] sm:$0xff]  ;;  %v310_v56 = vpop.permute.xlu0 %309 }
  0xb9   : > { %315 = vst.msk [vmem:[#allocation4 + $0xb] sm:$0xff] %vm313_vm4, %v310_v56  ;;  %v352_v57 = vmul.f32 %v351_v53, %v2851_v55  ;;  %v338_v58 = vmul.f32 %v337_v54, %v2851_v55  ;;  %v394_v2 = vmul.f32 %v393_v0, %v2851_v55  ;;  %v380_v3 = vmul.f32 %v379_v1, %v2851_v55 }
  0xba   : > { %v366_v4 = vmul.f32 %v365_v60, %v2851_v55  ;;  %v429_v12 = vmul.f32 %v428_v10, %v2851_v55  ;;  %v408_v13 = vmul.f32 %v407_v5, %v2851_v55  ;;  %v449_v16 = vmul.f32 %v448_v14, %v2851_v55 }
  0xbb   : > { %356 = vrot.lane.b32.xlu0 %v352_v57, %s2674_s6  ;;  %342 = vrot.lane.b32.xlu2 %v338_v58, %s2675_s11  ;;  %v469_v20 = vmul.f32 %v468_v18, %v2851_v55  ;;  %v489_v24 = vmul.f32 %v488_v22, %v2851_v55  ;;  %v509_v28 = vmul.f32 %v508_v26, %v2851_v55  ;;  %v646_v56 = vstv %s2347_s20  ;;  %s2358_s20 = sld [smem:[#allocation11 + $0x1e]] }
  0xbc   : > { %v529_v33 = vmul.f32 %v528_v31, %v2851_v55  ;;  %v323_v35 = vpop.permute.xlu1 %322  ;;  %v567_v38 = vmul.f32 %v566_v36, %v2851_v55  ;;  %v587_v42 = vmul.f32 %v586_v40, %v2851_v55  ;;  %v607_v47 = vmul.f32 %v606_v45, %v2851_v55 }
  0xbd   : > { %327 = vst.msk [vmem:[#allocation5 + $0xb] sm:$0xff] %vm313_vm4, %v323_v35  ;;  %v627_v52 = vmul.f32 %v626_v50, %v2851_v55  ;;  %v647_v58 = vmul.f32 %v646_v56, %v2851_v55  ;;  %v784_v35 = vstv %s2354_s24  ;;  %s2364_s24 = sld [smem:[#allocation11 + $0x24]] }
  0xc0   : > { %v2858_v59 = vld [vmem:[#allocation4 + $0x8] sm:$0xff]  ;;  %v2878_v9 = vld [vmem:[#allocation4 + $0x10] sm:$0x3f] }
  0xc1   : > { %v339_v61 = vmul.f32 %v337_v54, %v2858_v59  ;;  %v367_v62 = vmul.f32 %v365_v60, %v2858_v59  ;;  %v353_v63 = vmul.f32 %v351_v53, %v2858_v59  ;;  %v409_v6 = vmul.f32 %v407_v5, %v2858_v59 }
  0xc2   : > { %v395_v7 = vmul.f32 %v393_v0, %v2858_v59  ;;  %v381_v8 = vmul.f32 %v379_v1, %v2858_v59  ;;  %v431_v11 = vmul.f32 %v428_v10, %v2878_v9  ;;  %v451_v15 = vmul.f32 %v448_v14, %v2878_v9 }
  0xc3   : > { %372 = vrot.lane.b32.xlu0 %v367_v62, %s2676_s2  ;;  %358 = vrot.lane.b32.xlu1 %v353_v63, %s2674_s6  ;;  %v430_v17 = vmul.f32 %v428_v10, %v2858_v59  ;;  %v471_v19 = vmul.f32 %v468_v18, %v2878_v9  ;;  %v450_v21 = vmul.f32 %v448_v14, %v2858_v59  ;;  %v666_v63 = vstv %s2348_s29  ;;  %s3040_s29 = sld [smem:[#allocation11 + $0x1f]] }
  0xc4   : > { %344 = vrot.lane.b32.xlu2 %v339_v61, %s2675_s11  ;;  %v491_v23 = vmul.f32 %v488_v22, %v2878_v9  ;;  %v470_v25 = vmul.f32 %v468_v18, %v2858_v59  ;;  %v511_v27 = vmul.f32 %v508_v26, %v2878_v9  ;;  %v490_v29 = vmul.f32 %v488_v22, %v2858_v59 }
  0xc5   : > { %v531_v32 = vmul.f32 %v528_v31, %v2878_v9  ;;  %v510_v34 = vmul.f32 %v508_v26, %v2858_v59  ;;  %v569_v37 = vmul.f32 %v566_v36, %v2878_v9  ;;  %v530_v39 = vmul.f32 %v528_v31, %v2858_v59 }
  0xc6   : > { %v589_v41 = vmul.f32 %v586_v40, %v2878_v9  ;;  %v568_v43 = vmul.f32 %v566_v36, %v2858_v59  ;;  %v609_v46 = vmul.f32 %v606_v45, %v2878_v9  ;;  %v588_v48 = vmul.f32 %v586_v40, %v2858_v59 }
  0xc7   : > { %v629_v51 = vmul.f32 %v626_v50, %v2878_v9  ;;  %v608_v53 = vmul.f32 %v606_v45, %v2858_v59  ;;  %v649_v57 = vmul.f32 %v646_v56, %v2878_v9  ;;  %v628_v60 = vmul.f32 %v626_v50, %v2858_v59 }
  0xc8   : > { %v669_v0 = vmul.f32 %v666_v63, %v2878_v9  ;;  %v667_v1 = vmul.f32 %v666_v63, %v2851_v55  ;;  %v668_v10 = vmul.f32 %v666_v63, %v2858_v59  ;;  %v724_v14 = vstv %s2351_s21  ;;  %s2360_s21 = sld [smem:[#allocation11 + $0x20]] }
  0xc9   : > { %v787_v36 = vmul.f32 %v784_v35, %v2878_v9 }
  0xcb   : > { %398 = vrot.lane.b32.xlu0 %v394_v2, %s2677_s27  ;;  %384 = vrot.lane.b32.xlu1 %v380_v3, %s2678_s28  ;;  %v648_v2 = vmul.f32 %v646_v56, %v2858_v59 }
  0xcc   : > { %370 = vrot.lane.b32.xlu2 %v366_v4, %s2676_s2 }
  0xd3   : > { %414 = vrot.lane.b32.xlu0 %v409_v6, %s2679_s7  ;;  %400 = vrot.lane.b32.xlu1 %v395_v7, %s2677_s27  ;;  %v704_v6 = vstv %s2350_s8  ;;  %s3042_s8 = sld [smem:[#allocation6]] }
  0xd4   : > { %386 = vrot.lane.b32.xlu2 %v381_v8, %s2678_s28  ;;  %v707_v7 = vmul.f32 %v704_v6, %v2878_v9  ;;  %v705_v8 = vmul.f32 %v704_v6, %v2851_v55 }
  0xdb   : > { %439 = vrot.lane.b32.xlu0 %v431_v11, %s2675_s11  ;;  %435 = vrot.lane.b32.xlu1 %v429_v12, %s2675_s11 }
  0xdc   : > { %412 = vrot.lane.b32.xlu2 %v408_v13, %s2679_s7 }
  0xe3   : > { %459 = vrot.lane.b32.xlu0 %v451_v15, %s2674_s6  ;;  %455 = vrot.lane.b32.xlu1 %v449_v16, %s2674_s6  ;;  %v727_v15 = vmul.f32 %v724_v14, %v2878_v9  ;;  %v725_v16 = vmul.f32 %v724_v14, %v2851_v55 }
  0xe4   : > { %437 = vrot.lane.b32.xlu2 %v430_v17, %s2675_s11  ;;  %v706_v17 = vmul.f32 %v704_v6, %v2858_v59 }
  0xeb   : > { %479 = vrot.lane.b32.xlu0 %v471_v19, %s2676_s2  ;;  %475 = vrot.lane.b32.xlu1 %v469_v20, %s2676_s2 }
  0xec   : > { %457 = vrot.lane.b32.xlu2 %v450_v21, %s2674_s6  ;;  %v744_v21 = vstv %s2352_s10  ;;  %s2361_s10 = sld [smem:[#allocation11 + $0x21]] }
  0xed   : > { %v747_v22 = vmul.f32 %v744_v21, %v2878_v9  ;;  %v746_v31 = vmul.f32 %v744_v21, %v2858_v59 }
  0xf3   : > { %499 = vrot.lane.b32.xlu0 %v491_v23, %s2678_s28  ;;  %495 = vrot.lane.b32.xlu1 %v489_v24, %s2678_s28  ;;  %v745_v23 = vmul.f32 %v744_v21, %v2851_v55  ;;  %v726_v24 = vmul.f32 %v724_v14, %v2858_v59 }
  0xf4   : > { %477 = vrot.lane.b32.xlu2 %v470_v25, %s2676_s2 }
  0xfb   : > { %519 = vrot.lane.b32.xlu0 %v511_v27, %s2677_s27  ;;  %515 = vrot.lane.b32.xlu1 %v509_v28, %s2677_s27  ;;  %v764_v28 = vstv %s2353_s22  ;;  %s2362_s22 = sld [smem:[#allocation11 + $0x22]] }
  0xfc   : > { %497 = vrot.lane.b32.xlu2 %v490_v29, %s2678_s28  ;;  %v767_v29 = vmul.f32 %v764_v28, %v2878_v9  ;;  %v765_v30 = vmul.f32 %v764_v28, %v2851_v55 }
 0x103   : > { %539 = vrot.lane.b32.xlu0 %v531_v32, %s2679_s7  ;;  %535 = vrot.lane.b32.xlu1 %v529_v33, %s2679_s7 }
 0x104   : > { %517 = vrot.lane.b32.xlu2 %v510_v34, %s2677_s27 }
 0x10b   : > { %577 = vrot.lane.b32.xlu0 %v569_v37, %s2675_s11  ;;  %573 = vrot.lane.b32.xlu1 %v567_v38, %s2675_s11  ;;  %v785_v37 = vmul.f32 %v784_v35, %v2851_v55  ;;  %v766_v38 = vmul.f32 %v764_v28, %v2858_v59 }
 0x10c   : > { %537 = vrot.lane.b32.xlu2 %v530_v39, %s2679_s7 }
 0x113   : > { %597 = vrot.lane.b32.xlu0 %v589_v41, %s2674_s6  ;;  %593 = vrot.lane.b32.xlu1 %v587_v42, %s2674_s6  ;;  %v804_v42 = vstv %s2355_s30  ;;  %s2342_s30 = sld [smem:[#allocation11 + $0xe]] }
 0x114   : > { %575 = vrot.lane.b32.xlu2 %v568_v43, %s2675_s11  ;;  %v333_v43 = vstv %s332_s4  ;;  %v807_v45 = vmul.f32 %v804_v42, %v2878_v9  ;;  %s2365_s4 = sld [smem:[#allocation11 + $0x25]] }
 0x115   : > { %v2930_v44 = vpop.permute.xlu2 %342  ;;  %v335_v50 = vmul.f32 %v333_v43, %v2858_v59 }
 0x11b   : > { %617 = vrot.lane.b32.xlu0 %v609_v46, %s2676_s2  ;;  %613 = vrot.lane.b32.xlu1 %v607_v47, %s2676_s2  ;;  %v805_v46 = vmul.f32 %v804_v42, %v2851_v55  ;;  %v786_v47 = vmul.f32 %v784_v35, %v2858_v59 }
 0x11c   : > { %595 = vrot.lane.b32.xlu2 %v588_v48, %s2674_s6  ;;  %v334_v48 = vmul.f32 %v333_v43, %v2851_v55 }
 0x11e   : > { %v2938_v49 = vpop.permute.xlu2 %344 }
 0x123   : > { %637 = vrot.lane.b32.xlu0 %v629_v51, %s2678_s28  ;;  %633 = vrot.lane.b32.xlu1 %v627_v52, %s2678_s28  ;;  %v348_v51 = vadd.f32 %v2930_v44, %v334_v48  ;;  %v349_v52 = vadd.f32 %v2938_v49, %v335_v50 }
 0x124   : > { %615 = vrot.lane.b32.xlu2 %v608_v53, %s2676_s2 }
 0x126   : > { %v2946_v54 = vpop.permute.xlu2 %370 }
 0x12b   : > { %657 = vrot.lane.b32.xlu0 %v649_v57, %s2677_s27  ;;  %653 = vrot.lane.b32.xlu1 %v647_v58, %s2677_s27  ;;  %v842_v58 = vstv %s2357_s12  ;;  %s2366_s12 = sld [smem:[#allocation11 + $0x26]] }
 0x12c   : > { %635 = vrot.lane.b32.xlu2 %v628_v60, %s2678_s28  ;;  %v843_v6 = vmul.f32 %v842_v58, %v2851_v55 }
 0x12d   : > { %v2954_v61 = vpop.permute.xlu0 %356 }
 0x12e   : > { %v2956_v62 = vpop.permute.xlu2 %386  ;;  %v362_v60 = vadd.f32 %v2954_v61, %v348_v51 }
 0x130   : > { %v376_v61 = vadd.f32 %v2946_v54, %v362_v60 }
 0x133   : > { %677 = vrot.lane.b32.xlu0 %v669_v0, %s2679_s7  ;;  %673 = vrot.lane.b32.xlu1 %v667_v1, %s2679_s7  ;;  %v423_v0 = vstv %s2335_s13  ;;  %s2367_s13 = sld [smem:[#allocation11 + $0x27]] }
 0x134   : > { %655 = vrot.lane.b32.xlu2 %v648_v2, %s2677_s27  ;;  %v425_v1 = vmul.f32 %v423_v0, %v2858_v59  ;;  %v845_v2 = vmul.f32 %v842_v58, %v2878_v9  ;;  %v424_v49 = vmul.f32 %v423_v0, %v2851_v55 }
 0x135   : > { %v2964_v3 = vpop.permute.xlu1 %358  ;;  %v2966_v4 = vpop.permute.xlu0 %372 }
 0x136   : > { %v2968_v5 = vpop.permute.xlu2 %412  ;;  %v363_v63 = vadd.f32 %v2964_v3, %v349_v52 }
 0x13b   : > { %715 = vrot.lane.b32.xlu0 %v707_v7, %s2675_s11  ;;  %711 = vrot.lane.b32.xlu1 %v705_v8, %s2675_s11  ;;  %v426_v7 = vmul.f32 %v423_v0, %v2878_v9  ;;  %v806_v8 = vmul.f32 %v804_v42, %v2858_v59  ;;  %v882_v42 = vstv %s3040_s29  ;;  %s2369_s29 = sld [smem:[#allocation11 + $0x29]] }
 0x13c   : > { %675 = vrot.lane.b32.xlu2 %v668_v10, %s2679_s7  ;;  %v377_v10 = vadd.f32 %v2966_v4, %v363_v63  ;;  %v885_v50 = vmul.f32 %v882_v42, %v2878_v9  ;;  %v902_v63 = vstv %s2360_s21  ;;  %s2349_s21 = sld [smem:[#allocation11 + $0x15]] }
 0x13d   : > { %v2976_v11 = vpop.permute.xlu1 %384  ;;  %v2978_v12 = vpop.permute.xlu0 %398  ;;  %v905_v0 = vmul.f32 %v902_v63, %v2878_v9 }
 0x13e   : > { %v2980_v13 = vpop.permute.xlu2 %437 }
 0x13f   : > { %v445_v44 = vadd.f32 %v2980_v13, %v425_v1  ;;  %v390_v13 = vadd.f32 %v2976_v11, %v376_v61  ;;  %v903_v1 = vmul.f32 %v902_v63, %v2851_v55  ;;  %v904_v61 = vmul.f32 %v902_v63, %v2858_v59 }
 0x141   : > { %v404_v11 = vadd.f32 %v2978_v12, %v390_v13  ;;  %v942_v13 = vstv %s2362_s22  ;;  %s2373_s22 = sld [smem:[#allocation11 + $0x2d]] }
 0x143   : > { %735 = vrot.lane.b32.xlu0 %v727_v15, %s2674_s6  ;;  %731 = vrot.lane.b32.xlu1 %v725_v16, %s2674_s6 }
 0x144   : > { %713 = vrot.lane.b32.xlu2 %v706_v17, %s2675_s11 }
 0x145   : > { %v2988_v18 = vpop.permute.xlu1 %400  ;;  %v2990_v19 = vpop.permute.xlu0 %414 }
 0x146   : > { %v2992_v20 = vpop.permute.xlu2 %457 }
 0x147   : > { %v465_v3 = vadd.f32 %v2992_v20, %v445_v44  ;;  %v391_v20 = vadd.f32 %v2956_v62, %v377_v10 }
 0x149   : > { %v405_v28 = vadd.f32 %v2988_v18, %v391_v20  ;;  %v418_v18 = vadd.f32 %v2968_v5, %v404_v11  ;;  %v883_v5 = vmul.f32 %v882_v42, %v2851_v55  ;;  %v980_v20 = vstv %s2364_s24  ;;  %s2374_s24 = sld [smem:[#allocation11 + $0x2e]] }
 0x14a   : > { %v981_v11 = vmul.f32 %v980_v20, %v2851_v55 }
 0x14b   : > { %755 = vrot.lane.b32.xlu0 %v747_v22, %s2676_s2  ;;  %751 = vrot.lane.b32.xlu1 %v745_v23, %s2676_s2  ;;  %v862_v23 = vstv %s2358_s20  ;;  %v419_v35 = vadd.f32 %v2990_v19, %v405_v28  ;;  %s2368_s20 = sld [smem:[#allocation11 + $0x28]] }
 0x14c   : > { %733 = vrot.lane.b32.xlu2 %v726_v24, %s2674_s6  ;;  %v864_v52 = vmul.f32 %v862_v23, %v2858_v59 }
 0x14d   : > { %v436_v25 = vpop.permute.xlu1 %435  ;;  %v440_v26 = vpop.permute.xlu0 %439 }
 0x14e   : > { %v3000_v27 = vpop.permute.xlu2 %477  ;;  %v444_v14 = vadd.f32 %v436_v25, %v424_v49  ;;  %v446_v15 = vadd.f32 %v440_v26, %v426_v7  ;;  %v922_v7 = vstv %s2361_s10  ;;  %s2372_s10 = sld [smem:[#allocation11 + $0x2c]] }
 0x14f   : > { %v485_v54 = vadd.f32 %v3000_v27, %v465_v3  ;;  %v923_v10 = vmul.f32 %v922_v7, %v2851_v55 }
 0x153   : > { %775 = vrot.lane.b32.xlu0 %v767_v29, %s2678_s28  ;;  %771 = vrot.lane.b32.xlu1 %v765_v30, %s2678_s28  ;;  %v865_v29 = vmul.f32 %v862_v23, %v2878_v9  ;;  %v863_v30 = vmul.f32 %v862_v23, %v2851_v55 }
 0x154   : > { %753 = vrot.lane.b32.xlu2 %v746_v31, %s2676_s2 }
 0x155   : > { %v456_v32 = vpop.permute.xlu1 %455  ;;  %v460_v33 = vpop.permute.xlu0 %459 }
 0x156   : > { %v498_v34 = vpop.permute.xlu2 %497  ;;  %v464_v4 = vadd.f32 %v456_v32, %v444_v14  ;;  %v466_v21 = vadd.f32 %v460_v33, %v446_v15  ;;  %v844_v33 = vmul.f32 %v842_v58, %v2858_v59 }
 0x157   : > { %v505_v24 = vadd.f32 %v498_v34, %v485_v54  ;;  %v924_v54 = vmul.f32 %v922_v7, %v2858_v59 }
 0x15b   : > { %795 = vrot.lane.b32.xlu0 %v787_v36, %s2677_s27  ;;  %791 = vrot.lane.b32.xlu1 %v785_v37, %s2677_s27 }
 0x15c   : > { %773 = vrot.lane.b32.xlu2 %v766_v38, %s2678_s28  ;;  %v328_v38 = vstv %s3042_s8  ;;  %s2371_s8 = sld [smem:[#allocation11 + $0x2b]] }
 0x15d   : > { %v476_v39 = vpop.permute.xlu1 %475  ;;  %v480_v40 = vpop.permute.xlu0 %479  ;;  %v421_v48 = vadd.f32 %v419_v35, %v328_v38 }
 0x15e   : > { %v518_v41 = vpop.permute.xlu2 %517  ;;  %v484_v25 = vadd.f32 %v476_v39, %v464_v4  ;;  %v486_v26 = vadd.f32 %v480_v40, %v466_v21 }
 0x15f   : > { %v525_v27 = vadd.f32 %v518_v41, %v505_v24  ;;  %v561_v24 = vstv %s2342_s30  ;;  %s2375_s30 = sld [smem:[#allocation11 + $0x2f]] }
 0x163   : > { %815 = vrot.lane.b32.xlu0 %v807_v45, %s2679_s7  ;;  %811 = vrot.lane.b32.xlu1 %v805_v46, %s2679_s7 }
 0x164   : > { %793 = vrot.lane.b32.xlu2 %v786_v47, %s2677_s27  ;;  %v420_v47 = vadd.f32 %v418_v18, %v328_v38 }
 0x165   : > { %v496_v53 = vpop.permute.xlu1 %495  ;;  %v500_v56 = vpop.permute.xlu0 %499 }
 0x166   : > { %v538_v57 = vpop.permute.xlu2 %537  ;;  %v504_v31 = vadd.f32 %v496_v53, %v484_v25  ;;  %v506_v32 = vadd.f32 %v500_v56, %v486_v26  ;;  %v563_v25 = vmul.f32 %v561_v24, %v2858_v59  ;;  %v983_v26 = vmul.f32 %v980_v20, %v2878_v9 }
 0x167   : > { %v545_v62 = vadd.f32 %v538_v57, %v525_v27  ;;  %v944_v27 = vmul.f32 %v942_v13, %v2858_v59 }
 0x169   : > { %v552_v43 = vrot.slane %v545_v62, 1 }
 0x16b   : > { %853 = vrot.lane.b32.xlu0 %v845_v2, %s2675_s11  ;;  %849 = vrot.lane.b32.xlu1 %v843_v6, %s2675_s11  ;;  %v884_v2 = vmul.f32 %v882_v42, %v2858_v59 }
 0x16c   : > { %813 = vrot.lane.b32.xlu2 %v806_v8, %s2679_s7  ;;  %v925_v8 = vmul.f32 %v922_v7, %v2878_v9 }
 0x16d   : > { %v516_v16 = vpop.permute.xlu1 %515  ;;  %v520_v17 = vpop.permute.xlu0 %519 }
 0x16e   : > { %v3045_v22 = vpop.permute.xlu2 %575  ;;  %v524_v34 = vadd.f32 %v516_v16, %v504_v31  ;;  %v526_v12 = vadd.f32 %v520_v17, %v506_v32  ;;  %v945_v16 = vmul.f32 %v942_v13, %v2878_v9  ;;  %v943_v17 = vmul.f32 %v942_v13, %v2851_v55 }
 0x16f   : > { %v583_v28 = vadd.f32 %v3045_v22, %v563_v25 }
 0x173   : > { %873 = vrot.lane.b32.xlu0 %v865_v29, %s2674_s6  ;;  %869 = vrot.lane.b32.xlu1 %v863_v30, %s2674_s6  ;;  %v562_v29 = vmul.f32 %v561_v24, %v2851_v55  ;;  %v564_v30 = vmul.f32 %v561_v24, %v2878_v9 }
 0x174   : > { %851 = vrot.lane.b32.xlu2 %v844_v33, %s2675_s11 }
 0x175   : > { %v536_v36 = vpop.permute.xlu1 %535  ;;  %v540_v37 = vpop.permute.xlu0 %539 }
 0x176   : > { %v544_v39 = vadd.f32 %v536_v36, %v524_v34  ;;  %v3059_v40 = vpop.permute.xlu2 %595  ;;  %v546_v41 = vadd.f32 %v540_v37, %v526_v12  ;;  %v1000_v36 = vstv %s2365_s4  ;;  %s2376_s4 = sld [smem:[#allocation11 + $0x30]] }
 0x177   : > { %v603_v31 = vadd.f32 %v3059_v40, %v583_v28  ;;  %v1001_v40 = vmul.f32 %v1000_v36, %v2851_v55 }
 0x178   : > { %v551_v45 = vrot.slane %v544_v39, 1  ;;  %v554_v46 = vrot.slane %v546_v41, 1  ;;  %v1003_v41 = vmul.f32 %v1000_v36, %v2878_v9 }
 0x17a   : > { %v553_v19 = vsel %vm550_vm5, %v551_v45, %v552_v43  ;;  %v555_v51 = vsel %vm550_vm5, %v552_v43, %v554_v46  ;;  %v982_v46 = vmul.f32 %v980_v20, %v2858_v59 }
 0x17b   : > { %v3067_v53 = vadd.f32 %v553_v19, %v420_v47  ;;  %v3069_v56 = vadd.f32 %v555_v51, %v421_v48  ;;  %893 = vrot.lane.b32.xlu0 %v885_v50, %s2676_s2  ;;  %889 = vrot.lane.b32.xlu1 %v883_v5, %s2676_s2 }
 0x17c   : > { %871 = vrot.lane.b32.xlu2 %v864_v52, %s2674_s6 }
 0x17d   : > { %v574_v57 = vpop.permute.xlu1 %573  ;;  %v578_v58 = vpop.permute.xlu0 %577 }
 0x17e   : > { %v616_v60 = vpop.permute.xlu2 %615  ;;  %v582_v32 = vadd.f32 %v574_v57, %v562_v29  ;;  %v584_v33 = vadd.f32 %v578_v58, %v564_v30  ;;  %v1020_v58 = vstv %s2366_s12  ;;  %s3192_s12 = sld [smem:[#allocation11 + $0x33]] }
 0x17f   : > { %v623_v12 = vadd.f32 %v616_v60, %v603_v31 }
 0x183   : > { %913 = vrot.lane.b32.xlu0 %v905_v0, %s2678_s28  ;;  %909 = vrot.lane.b32.xlu1 %v903_v1, %s2678_s28  ;;  %v1023_v1 = vmul.f32 %v1020_v58, %v2878_v9 }
 0x184   : > { %891 = vrot.lane.b32.xlu2 %v884_v2, %s2676_s2  ;;  %v1021_v2 = vmul.f32 %v1020_v58, %v2851_v55 }
 0x185   : > { %v594_v6 = vpop.permute.xlu1 %593  ;;  %v598_v44 = vpop.permute.xlu0 %597 }
 0x186   : > { %v636_v49 = vpop.permute.xlu2 %635  ;;  %v602_v22 = vadd.f32 %v594_v6, %v582_v32  ;;  %v604_v18 = vadd.f32 %v598_v44, %v584_v33  ;;  %v1118_v32 = vstv %s2371_s8  ;;  %v699_v33 = vstv %s2349_s21  ;;  %s3223_s8 = sld [smem:[#allocation11 + $0x36]] }
 0x187   : > { %v643_v37 = vadd.f32 %v636_v49, %v623_v12  ;;  %v1002_v49 = vmul.f32 %v1000_v36, %v2858_v59  ;;  %v1119_v12 = vmul.f32 %v1118_v32, %v2851_v55  ;;  %v702_v36 = vmul.f32 %v699_v33, %v2878_v9  ;;  %s3228_s21 = sld [smem:[#allocation11 + $0x35]] }
 0x18b   : > { %933 = vrot.lane.b32.xlu0 %v925_v8, %s2677_s27  ;;  %929 = vrot.lane.b32.xlu1 %v923_v10, %s2677_s27 }
 0x18c   : > { %911 = vrot.lane.b32.xlu2 %v904_v61, %s2678_s28 }
 0x18d   : > { %v614_v3 = vpop.permute.xlu1 %613  ;;  %v618_v14 = vpop.permute.xlu0 %617 }
 0x18e   : > { %v656_v15 = vpop.permute.xlu2 %655  ;;  %v622_v38 = vadd.f32 %v614_v3, %v602_v22  ;;  %v624_v39 = vadd.f32 %v618_v14, %v604_v18  ;;  %v1040_v14 = vstv %s2367_s13  ;;  %v700_v18 = vmul.f32 %v699_v33, %v2851_v55  ;;  %s3194_s13 = sld [smem:[#allocation11 + $0x32]] }
 0x18f   : > { %v663_v42 = vadd.f32 %v656_v15, %v643_v37  ;;  %v1043_v15 = vmul.f32 %v1040_v14, %v2878_v9  ;;  %v1041_v13 = vmul.f32 %v1040_v14, %v2851_v55 }
 0x193   : > { %953 = vrot.lane.b32.xlu0 %v945_v16, %s2679_s7  ;;  %949 = vrot.lane.b32.xlu1 %v943_v17, %s2679_s7 }
 0x194   : > { %931 = vrot.lane.b32.xlu2 %v924_v54, %s2677_s27  ;;  %v1060_v54 = vstv %s2368_s20  ;;  %s2356_s20 = sld [smem:[#allocation11 + $0x1c]] }
 0x195   : > { %v634_v4 = vpop.permute.xlu1 %633  ;;  %v638_v21 = vpop.permute.xlu0 %637  ;;  %v1062_v29 = vmul.f32 %v1060_v54, %v2858_v59 }
 0x196   : > { %v676_v23 = vpop.permute.xlu2 %675  ;;  %v642_v43 = vadd.f32 %v634_v4, %v622_v38  ;;  %v644_v45 = vadd.f32 %v638_v21, %v624_v39  ;;  %v1063_v4 = vmul.f32 %v1060_v54, %v2878_v9  ;;  %v1061_v21 = vmul.f32 %v1060_v54, %v2851_v55 }
 0x197   : > { %v683_v47 = vadd.f32 %v676_v23, %v663_v42  ;;  %v1042_v23 = vmul.f32 %v1040_v14, %v2858_v59 }
 0x199   : > { %v690_v60 = vrot.slane %v683_v47, 2  ;;  %v1138_v47 = vstv %s2372_s10  ;;  %s2363_s10 = sld [smem:[#allocation11 + $0x23]] }
 0x19b   : > { %991 = vrot.lane.b32.xlu0 %v983_v26, %s2675_s11  ;;  %987 = vrot.lane.b32.xlu1 %v981_v11, %s2675_s11  ;;  %v1080_v26 = vstv %s2369_s29  ;;  %s3208_s29 = sld [smem:[#allocation11 + $0x34]] }
 0x19c   : > { %951 = vrot.lane.b32.xlu2 %v944_v27, %s2679_s7  ;;  %v1083_v11 = vmul.f32 %v1080_v26, %v2878_v9  ;;  %v1081_v28 = vmul.f32 %v1080_v26, %v2851_v55  ;;  %v1082_v37 = vmul.f32 %v1080_v26, %v2858_v59 }
 0x19d   : > { %v654_v62 = vpop.permute.xlu1 %653  ;;  %v658_v34 = vpop.permute.xlu0 %657 }
 0x19e   : > { %v3103_v35 = vpop.permute.xlu2 %713  ;;  %v662_v48 = vadd.f32 %v654_v62, %v642_v43  ;;  %v664_v50 = vadd.f32 %v658_v34, %v644_v45  ;;  %v701_v62 = vmul.f32 %v699_v33, %v2858_v59  ;;  %v1121_v34 = vmul.f32 %v1118_v32, %v2878_v9 }
 0x1a0   : > { %v721_v22 = vadd.f32 %v3103_v35, %v701_v62 }
 0x1a3   : > { %1011 = vrot.lane.b32.xlu0 %v1003_v41, %s2674_s6  ;;  %1007 = vrot.lane.b32.xlu1 %v1001_v40, %s2674_s6 }
 0x1a4   : > { %989 = vrot.lane.b32.xlu2 %v982_v46, %s2675_s11 }
 0x1a5   : > { %v674_v5 = vpop.permute.xlu1 %673  ;;  %v678_v19 = vpop.permute.xlu0 %677 }
 0x1a6   : > { %v682_v51 = vadd.f32 %v674_v5, %v662_v48  ;;  %v3111_v52 = vpop.permute.xlu2 %733  ;;  %v684_v57 = vadd.f32 %v678_v19, %v664_v50  ;;  %v1141_v19 = vmul.f32 %v1138_v47, %v2878_v9 }
 0x1a7   : > { %v741_v38 = vadd.f32 %v3111_v52, %v721_v22 }
 0x1a8   : > { %v689_v63 = vrot.slane %v682_v51, 2  ;;  %v692_v0 = vrot.slane %v684_v57, 2  ;;  %v1139_v51 = vmul.f32 %v1138_v47, %v2851_v55 }
 0x1aa   : > { %v691_v6 = vsel %vm688_vm6, %v689_v63, %v690_v60  ;;  %v693_v44 = vsel %vm688_vm6, %v690_v60, %v692_v0  ;;  %v1120_v60 = vmul.f32 %v1118_v32, %v2858_v59 }
 0x1ab   : > { %v3119_v7 = vadd.f32 %v691_v6, %v3067_v53  ;;  %v3122_v8 = vadd.f32 %v693_v44, %v3069_v56  ;;  %1031 = vrot.lane.b32.xlu0 %v1023_v1, %s2676_s2  ;;  %1027 = vrot.lane.b32.xlu1 %v1021_v2, %s2676_s2  ;;  %v1022_v53 = vmul.f32 %v1020_v58, %v2858_v59 }
 0x1ac   : > { %1009 = vrot.lane.b32.xlu2 %v1002_v49, %s2674_s6 }
 0x1ad   : > { %v712_v10 = vpop.permute.xlu1 %711  ;;  %v716_v61 = vpop.permute.xlu0 %715 }
 0x1ae   : > { %v754_v3 = vpop.permute.xlu2 %753  ;;  %v720_v39 = vadd.f32 %v712_v10, %v700_v18  ;;  %v722_v41 = vadd.f32 %v716_v61, %v702_v36  ;;  %v1158_v61 = vstv %s2373_s22  ;;  %s3238_s22 = sld [smem:[#allocation11 + $0x37]] }
 0x1af   : > { %v761_v43 = vadd.f32 %v754_v3, %v741_v38  ;;  %v3204_v38 = vld [vmem:[#allocation5] sm:$0xff] }
 0x1b3   : > { %1051 = vrot.lane.b32.xlu0 %v1043_v15, %s2678_s28  ;;  %1047 = vrot.lane.b32.xlu1 %v1041_v13, %s2678_s28  ;;  %v1161_v13 = vmul.f32 %v1158_v61, %v2878_v9 }
 0x1b4   : > { %1029 = vrot.lane.b32.xlu2 %v1022_v53, %s2676_s2  ;;  %v1159_v53 = vmul.f32 %v1158_v61, %v2851_v55 }
 0x1b5   : > { %v732_v56 = vpop.permute.xlu1 %731  ;;  %v736_v16 = vpop.permute.xlu0 %735 }
 0x1b6   : > { %v774_v17 = vpop.permute.xlu2 %773  ;;  %v740_v35 = vadd.f32 %v732_v56, %v720_v39  ;;  %v742_v45 = vadd.f32 %v736_v16, %v722_v41  ;;  %v1272_v41 = vstv %s3192_s12  ;;  %s2370_s12 = sld [smem:[#allocation11 + $0x2a]] }
 0x1b7   : > { %v781_v48 = vadd.f32 %v774_v17, %v761_v43  ;;  %v1140_v17 = vmul.f32 %v1138_v47, %v2858_v59  ;;  %v3210_v43 = vld [vmem:[#allocation4 + $0x8] sm:$0xff] }
 0x1bb   : > { %1071 = vrot.lane.b32.xlu0 %v1063_v4, %s2677_s27  ;;  %1067 = vrot.lane.b32.xlu1 %v1061_v21, %s2677_s27 }
 0x1bc   : > { %1049 = vrot.lane.b32.xlu2 %v1042_v23, %s2678_s28 }
 0x1bd   : > { %v752_v20 = vpop.permute.xlu1 %751  ;;  %v756_v24 = vpop.permute.xlu0 %755 }
 0x1be   : > { %v794_v25 = vpop.permute.xlu2 %793  ;;  %v760_v50 = vadd.f32 %v752_v20, %v740_v35  ;;  %v762_v5 = vadd.f32 %v756_v24, %v742_v45  ;;  %v1178_v24 = vstv %s2374_s24  ;;  %v1273_v35 = vmul.f32 %v1272_v41, %v3204_v38  ;;  %s2385_s24 = sld [smem:[#allocation11 + $0x39]] }
 0x1bf   : > { %v801_v52 = vadd.f32 %v794_v25, %v781_v48  ;;  %v1181_v25 = vmul.f32 %v1178_v24, %v2878_v9  ;;  %v1179_v26 = vmul.f32 %v1178_v24, %v2851_v55 }
 0x1c3   : > { %1091 = vrot.lane.b32.xlu0 %v1083_v11, %s2679_s7  ;;  %1087 = vrot.lane.b32.xlu1 %v1081_v28, %s2679_s7 }
 0x1c4   : > { %1069 = vrot.lane.b32.xlu2 %v1062_v29, %s2677_s27  ;;  %v1198_v29 = vstv %s2375_s30  ;;  %s2386_s30 = sld [smem:[#allocation11 + $0x3a]] }
 0x1c5   : > { %v772_v30 = vpop.permute.xlu1 %771  ;;  %v776_v27 = vpop.permute.xlu0 %775  ;;  %v1200_v18 = vmul.f32 %v1198_v29, %v2858_v59 }
 0x1c6   : > { %v814_v31 = vpop.permute.xlu2 %813  ;;  %v780_v57 = vadd.f32 %v772_v30, %v760_v50  ;;  %v782_v58 = vadd.f32 %v776_v27, %v762_v5  ;;  %v1201_v30 = vmul.f32 %v1198_v29, %v2878_v9  ;;  %v1199_v27 = vmul.f32 %v1198_v29, %v2851_v55 }
 0x1c7   : > { %v821_v63 = vadd.f32 %v814_v31, %v801_v52  ;;  %v1180_v31 = vmul.f32 %v1178_v24, %v2858_v59  ;;  %v1314_v24 = vstv %s3223_s8  ;;  %s2392_s8 = sld [smem:[#allocation11 + $0x40]] }
 0x1c9   : > { %v828_v3 = vrot.slane %v821_v63, 3 }
 0x1cb   : > { %1129 = vrot.lane.b32.xlu0 %v1121_v34, %s2675_s11  ;;  %1125 = vrot.lane.b32.xlu1 %v1119_v12, %s2675_s11  ;;  %v1218_v34 = vstv %s2376_s4  ;;  %v3197_v12 = vld [vmem:[#allocation4] sm:$0xff]  ;;  %s2387_s4 = sld [smem:[#allocation11 + $0x3b]] }
 0x1cc   : > { %1089 = vrot.lane.b32.xlu2 %v1082_v37, %s2679_s7  ;;  %v1221_v55 = vmul.f32 %v1218_v34, %v2878_v9  ;;  %v1219_v22 = vmul.f32 %v3197_v12, %v1218_v34  ;;  %v1220_v5 = vmul.f32 %v3210_v43, %v1218_v34  ;;  %v975_v34 = vstv %s2363_s10  ;;  %s2394_s10 = sld [smem:[#allocation11 + $0x42]] }
 0x1cd   : > { %v792_v40 = vpop.permute.xlu1 %791  ;;  %v796_v42 = vpop.permute.xlu0 %795 }
 0x1ce   : > { %v3156_v46 = vpop.permute.xlu2 %851  ;;  %v800_v0 = vadd.f32 %v792_v40, %v780_v57  ;;  %v802_v1 = vadd.f32 %v796_v42, %v782_v58  ;;  %v1258_v40 = vstv %s3194_s13  ;;  %v837_v42 = vstv %s2356_s20  ;;  %s2388_s13 = sld [smem:[#allocation11 + $0x3c]] }
 0x1cf   : > { %v1259_v45 = vmul.f32 %v1258_v40, %v3204_v38  ;;  %v838_v48 = vmul.f32 %v3197_v12, %v837_v42  ;;  %v840_v50 = vmul.f32 %v837_v42, %v2878_v9  ;;  %s2389_s20 = sld [smem:[#allocation11 + $0x3d]] }
 0x1d3   : > { %1149 = vrot.lane.b32.xlu0 %v1141_v19, %s2674_s6  ;;  %1145 = vrot.lane.b32.xlu1 %v1139_v51, %s2674_s6 }
 0x1d4   : > { %1127 = vrot.lane.b32.xlu2 %v1120_v60, %s2675_s11 }
 0x1d5   : > { %v812_v2 = vpop.permute.xlu1 %811  ;;  %v816_v6 = vpop.permute.xlu0 %815 }
 0x1d6   : > { %v820_v44 = vadd.f32 %v812_v2, %v800_v0  ;;  %v3164_v49 = vpop.permute.xlu2 %871  ;;  %v822_v10 = vadd.f32 %v816_v6, %v802_v1  ;;  %v1286_v1 = vstv %s3208_s29  ;;  %s2390_s29 = sld [smem:[#allocation11 + $0x3e]] }
 0x1d8   : > { %v827_v14 = vrot.slane %v820_v44, 3  ;;  %v830_v15 = vrot.slane %v822_v10, 3 }
 0x1da   : > { %v829_v56 = vsel %vm826_vm7, %v827_v14, %v828_v3  ;;  %v831_v16 = vsel %vm826_vm7, %v828_v3, %v830_v15 }
 0x1db   : > { %v3172_v54 = vadd.f32 %v829_v56, %v3119_v7  ;;  %v3175_v4 = vadd.f32 %v831_v16, %v3122_v8  ;;  %1169 = vrot.lane.b32.xlu0 %v1161_v13, %s2676_s2  ;;  %1165 = vrot.lane.b32.xlu1 %v1159_v53, %s2676_s2  ;;  %v1160_v7 = vmul.f32 %v1158_v61, %v2858_v59 }
 0x1dc   : > { %1147 = vrot.lane.b32.xlu2 %v1140_v17, %s2674_s6  ;;  %v839_v59 = vmul.f32 %v3210_v43, %v837_v42 }
 0x1dd   : > { %v850_v21 = vpop.permute.xlu1 %849  ;;  %v854_v23 = vpop.permute.xlu0 %853 }
 0x1de   : > { %v892_v20 = vpop.permute.xlu2 %891  ;;  %v859_v47 = vadd.f32 %v3156_v46, %v839_v59  ;;  %v858_v51 = vadd.f32 %v850_v21, %v838_v48  ;;  %v860_v52 = vadd.f32 %v854_v23, %v840_v50  ;;  %v3225_v46 = vld [vmem:[#allocation5 + $0x8] sm:$0xff]  ;;  %v3262_v59 = vld [vmem:[#allocation5 + $0x10] sm:$0x3f] }
 0x1df   : > { %v1274_v10 = vmul.f32 %v1272_v41, %v3225_v46  ;;  %v1260_v15 = vmul.f32 %v1258_v40, %v3225_v46 }
 0x1e0   : > { %v879_v19 = vadd.f32 %v3164_v49, %v859_v47  ;;  %v1288_v49 = vmul.f32 %v1286_v1, %v3225_v46 }
 0x1e2   : > { %v899_v9 = vadd.f32 %v892_v20, %v879_v19 }
 0x1e3   : > { %1189 = vrot.lane.b32.xlu0 %v1181_v25, %s2678_s28  ;;  %1185 = vrot.lane.b32.xlu1 %v1179_v26, %s2678_s28  ;;  %v1300_v25 = vstv %s3228_s21  ;;  %s2393_s21 = sld [smem:[#allocation11 + $0x41]] }
 0x1e4   : > { %1167 = vrot.lane.b32.xlu2 %v1160_v7, %s2676_s2 }
 0x1e5   : > { %v870_v8 = vpop.permute.xlu1 %869  ;;  %v874_v11 = vpop.permute.xlu0 %873 }
 0x1e6   : > { %v912_v28 = vpop.permute.xlu2 %911  ;;  %v878_v60 = vadd.f32 %v870_v8, %v858_v51  ;;  %v880_v63 = vadd.f32 %v874_v11, %v860_v52  ;;  %v1315_v11 = vmul.f32 %v1314_v24, %v3204_v38  ;;  %v976_v52 = vmul.f32 %v3197_v12, %v975_v34 }
 0x1e7   : > { %v919_v2 = vadd.f32 %v912_v28, %v899_v9  ;;  %v1301_v28 = vmul.f32 %v1300_v25, %v3204_v38 }
 0x1eb   : > { %1209 = vrot.lane.b32.xlu0 %v1201_v30, %s2677_s27  ;;  %1205 = vrot.lane.b32.xlu1 %v1199_v27, %s2677_s27  ;;  %v1287_v27 = vmul.f32 %v1286_v1, %v3204_v38 }
 0x1ec   : > { %1187 = vrot.lane.b32.xlu2 %v1180_v31, %s2678_s28 }
 0x1ed   : > { %v890_v32 = vpop.permute.xlu1 %889  ;;  %v894_v33 = vpop.permute.xlu0 %893 }
 0x1ee   : > { %v932_v62 = vpop.permute.xlu2 %931  ;;  %v898_v6 = vadd.f32 %v890_v32, %v878_v60  ;;  %v900_v44 = vadd.f32 %v894_v33, %v880_v63  ;;  %v1369_v60 = vstv %s2386_s30  ;;  %s2396_s30 = sld [smem:[#allocation11 + $0x44]] }
 0x1ef   : > { %v939_v61 = vadd.f32 %v932_v62, %v919_v2  ;;  %v1372_v2 = vmul.f32 %v1369_v60, %v3262_v59 }
 0x1f3   : > { %1229 = vrot.lane.b32.xlu0 %v1221_v55, %s2679_s7  ;;  %1225 = vrot.lane.b32.xlu1 %v1219_v22, %s2679_s7  ;;  %v1328_v22 = vstv %s3238_s22  ;;  %s3324_s22 = sld [smem:[#allocation11 + $0x31]] }
 0x1f4   : > { %1207 = vrot.lane.b32.xlu2 %v1200_v18, %s2677_s27  ;;  %v977_v18 = vmul.f32 %v3210_v43, %v975_v34 }
 0x1f5   : > { %v910_v36 = vpop.permute.xlu1 %909  ;;  %v914_v37 = vpop.permute.xlu0 %913 }
 0x1f6   : > { %v952_v39 = vpop.permute.xlu2 %951  ;;  %v918_v3 = vadd.f32 %v910_v36, %v898_v6  ;;  %v920_v14 = vadd.f32 %v914_v37, %v900_v44  ;;  %v1302_v37 = vmul.f32 %v1300_v25, %v3225_v46  ;;  %v1370_v6 = vmul.f32 %v1369_v60, %v3204_v38 }
 0x1f7   : > { %v959_v13 = vadd.f32 %v952_v39, %v939_v61 }
 0x1f9   : > { %v966_v26 = vrot.slane %v959_v13, 4 }
 0x1fb   : > { %1277 = vrot.lane.b32.xlu0 %v1273_v35, %s2674_s6  ;;  %1263 = vrot.lane.b32.xlu1 %v1259_v45, %s2675_s11  ;;  %v1349_v45 = vstv %s2385_s24  ;;  %s2395_s24 = sld [smem:[#allocation11 + $0x43]] }
 0x1fc   : > { %1227 = vrot.lane.b32.xlu2 %v1220_v5, %s2679_s7  ;;  %v1352_v48 = vmul.f32 %v1349_v45, %v3262_v59  ;;  %v1350_v50 = vmul.f32 %v1349_v45, %v3204_v38  ;;  %v1329_v5 = vmul.f32 %v1328_v22, %v3204_v38 }
 0x1fd   : > { %v930_v57 = vpop.permute.xlu1 %929  ;;  %v934_v58 = vpop.permute.xlu0 %933 }
 0x1fe   : > { %v990_v0 = vpop.permute.xlu2 %989  ;;  %v938_v53 = vadd.f32 %v930_v57, %v918_v3  ;;  %v940_v56 = vadd.f32 %v934_v58, %v920_v14  ;;  %v3271_v57 = vld [vmem:[#allocation4 + $0x10] sm:$0x3f] }
 0x1ff   : > { %v997_v36 = vadd.f32 %v990_v0, %v977_v18  ;;  %v978_v58 = vmul.f32 %v3271_v57, %v975_v34 }
 0x203   : > { %1293 = vrot.lane.b32.xlu0 %v1288_v49, %s2676_s2  ;;  %1279 = vrot.lane.b32.xlu1 %v1274_v10, %s2674_s6  ;;  %v1351_v10 = vmul.f32 %v1349_v45, %v3225_v46 }
 0x204   : > { %1265 = vrot.lane.b32.xlu2 %v1260_v15, %s2675_s11 }
 0x205   : > { %v950_v16 = vpop.permute.xlu1 %949  ;;  %v954_v17 = vpop.permute.xlu0 %953 }
 0x206   : > { %v958_v21 = vadd.f32 %v950_v16, %v938_v53  ;;  %v1010_v23 = vpop.permute.xlu2 %1009  ;;  %v960_v20 = vadd.f32 %v954_v17, %v940_v56  ;;  %v1389_v16 = vstv %s2387_s4  ;;  %s2397_s4 = sld [smem:[#allocation11 + $0x45]] }
 0x207   : > { %v1017_v39 = vadd.f32 %v1010_v23, %v997_v36  ;;  %v1390_v23 = vmul.f32 %v1389_v16, %v3204_v38  ;;  %v1429_v36 = vstv %s2389_s20  ;;  %s2400_s20 = sld [smem:[#allocation11 + $0x48]] }
 0x208   : > { %v965_v7 = vrot.slane %v958_v21, 4  ;;  %v968_v8 = vrot.slane %v960_v20, 4  ;;  %v1392_v21 = vmul.f32 %v1389_v16, %v3262_v59  ;;  %v1371_v20 = vmul.f32 %v1369_v60, %v3225_v46 }
 0x20a   : > { %v967_v29 = vsel %vm964_vm8, %v965_v7, %v966_v26  ;;  %v969_v30 = vsel %vm964_vm8, %v966_v26, %v968_v8 }
 0x20b   : > { %v3246_v31 = vadd.f32 %v967_v29, %v3172_v54  ;;  %v3249_v32 = vadd.f32 %v969_v30, %v3175_v4  ;;  %1319 = vrot.lane.b32.xlu0 %v1315_v11, %s2677_s27  ;;  %1305 = vrot.lane.b32.xlu1 %v1301_v28, %s2678_s28  ;;  %v1330_v54 = vmul.f32 %v1328_v22, %v3225_v46  ;;  %v1409_v29 = vstv %s2388_s13  ;;  %s2384_s13 = sld [smem:[#allocation11 + $0x38]] }
 0x20c   : > { %1291 = vrot.lane.b32.xlu2 %v1287_v27, %s2676_s2  ;;  %v1316_v4 = vmul.f32 %v1314_v24, %v3225_v46  ;;  %v1113_v24 = vstv %s2370_s12  ;;  %v1412_v27 = vmul.f32 %v1409_v29, %v3262_v59  ;;  %v1411_v45 = vmul.f32 %v1409_v29, %v3225_v46  ;;  %s2399_s12 = sld [smem:[#allocation11 + $0x47]] }
 0x20d   : > { %v988_v33 = vpop.permute.xlu1 %987  ;;  %v992_v62 = vpop.permute.xlu0 %991  ;;  %v1115_v26 = vmul.f32 %v3210_v43, %v1113_v24 }
 0x20e   : > { %v1030_v55 = vpop.permute.xlu2 %1029  ;;  %v996_v0 = vadd.f32 %v988_v33, %v976_v52  ;;  %v998_v1 = vadd.f32 %v992_v62, %v978_v58  ;;  %v1410_v33 = vmul.f32 %v1409_v29, %v3204_v38  ;;  %v1391_v62 = vmul.f32 %v1389_v16, %v3225_v46 }
 0x20f   : > { %v1037_v41 = vadd.f32 %v1030_v55, %v1017_v39  ;;  %v1506_v16 = vstv %s2393_s21  ;;  %s2403_s21 = sld [smem:[#allocation11 + $0x4b]] }
 0x213   : > { %1335 = vrot.lane.b32.xlu0 %v1330_v54, %s2679_s7  ;;  %1321 = vrot.lane.b32.xlu1 %v1316_v4, %s2677_s27 }
 0x214   : > { %1307 = vrot.lane.b32.xlu2 %v1302_v37, %s2678_s28 }
 0x215   : > { %v1008_v40 = vpop.permute.xlu1 %1007  ;;  %v1012_v42 = vpop.permute.xlu0 %1011 }
 0x216   : > { %v1050_v35 = vpop.permute.xlu2 %1049  ;;  %v1016_v44 = vadd.f32 %v1008_v40, %v996_v0  ;;  %v1018_v49 = vadd.f32 %v1012_v42, %v998_v1  ;;  %v1430_v40 = vmul.f32 %v1429_v36, %v3204_v38  ;;  %v1431_v1 = vmul.f32 %v1429_v36, %v3225_v46 }
 0x217   : > { %v1057_v47 = vadd.f32 %v1050_v35, %v1037_v41  ;;  %v1432_v41 = vmul.f32 %v1429_v36, %v3262_v59  ;;  %v1546_v36 = vstv %s2395_s24  ;;  %s2391_s24 = sld [smem:[#allocation11 + $0x3f]] }
 0x21b   : > { %1360 = vrot.lane.b32.xlu0 %v1352_v48, %s2675_s11  ;;  %1356 = vrot.lane.b32.xlu1 %v1350_v50, %s2675_s11  ;;  %v1114_v48 = vmul.f32 %v3197_v12, %v1113_v24  ;;  %v1116_v50 = vmul.f32 %v3271_v57, %v1113_v24 }
 0x21c   : > { %1333 = vrot.lane.b32.xlu2 %v1329_v5, %s2679_s7 }
 0x21d   : > { %v1028_v19 = vpop.permute.xlu1 %1027  ;;  %v1032_v51 = vpop.permute.xlu0 %1031 }
 0x21e   : > { %v1070_v9 = vpop.permute.xlu2 %1069  ;;  %v1036_v61 = vadd.f32 %v1028_v19, %v1016_v44  ;;  %v1038_v3 = vadd.f32 %v1032_v51, %v1018_v49 }
 0x21f   : > { %v1077_v63 = vadd.f32 %v1070_v9, %v1057_v47  ;;  %v1449_v9 = vstv %s2390_s29  ;;  %s2401_s29 = sld [smem:[#allocation11 + $0x49]] }
 0x220   : > { %v1452_v0 = vmul.f32 %v1449_v9, %v3262_v59 }
 0x223   : > { %1380 = vrot.lane.b32.xlu0 %v1372_v2, %s2674_s6  ;;  %1376 = vrot.lane.b32.xlu1 %v1370_v6, %s2674_s6 }
 0x224   : > { %1358 = vrot.lane.b32.xlu2 %v1351_v10, %s2675_s11 }
 0x225   : > { %v1048_v14 = vpop.permute.xlu1 %1047  ;;  %v1052_v15 = vpop.permute.xlu0 %1051 }
 0x226   : > { %v1056_v13 = vadd.f32 %v1048_v14, %v1036_v61  ;;  %v1090_v53 = vpop.permute.xlu2 %1089  ;;  %v1058_v56 = vadd.f32 %v1052_v15, %v1038_v3  ;;  %v1451_v3 = vmul.f32 %v1449_v9, %v3225_v46 }
 0x227   : > { %v1097_v17 = vadd.f32 %v1090_v53, %v1077_v63  ;;  %v1450_v63 = vmul.f32 %v1449_v9, %v3204_v38  ;;  %v1548_v9 = vmul.f32 %v1546_v36, %v3225_v46 }
 0x229   : > { %v1104_v4 = vrot.slane %v1097_v17, 5 }
 0x22b   : > { %1400 = vrot.lane.b32.xlu0 %v1392_v21, %s2676_s2  ;;  %1396 = vrot.lane.b32.xlu1 %v1390_v23, %s2676_s2  ;;  %v1507_v21 = vmul.f32 %v1506_v16, %v3204_v38  ;;  %v1509_v23 = vmul.f32 %v1506_v16, %v3262_v59 }
 0x22c   : > { %1378 = vrot.lane.b32.xlu2 %v1371_v20, %s2674_s6 }
 0x22d   : > { %v1068_v25 = vpop.permute.xlu1 %1067  ;;  %v1072_v7 = vpop.permute.xlu0 %1071 }
 0x22e   : > { %v1076_v8 = vadd.f32 %v1068_v25, %v1056_v13  ;;  %v1128_v11 = vpop.permute.xlu2 %1127  ;;  %v1078_v28 = vadd.f32 %v1072_v7, %v1058_v56 }
 0x22f   : > { %v1135_v30 = vadd.f32 %v1128_v11, %v1115_v26  ;;  %v1526_v11 = vstv %s2394_s10  ;;  %s2404_s10 = sld [smem:[#allocation11 + $0x4c]] }
 0x230   : > { %v1527_v29 = vmul.f32 %v1526_v11, %v3204_v38 }
 0x233   : > { %1420 = vrot.lane.b32.xlu0 %v1412_v27, %s2678_s28  ;;  %1416 = vrot.lane.b32.xlu1 %v1410_v33, %s2678_s28  ;;  %v1508_v27 = vmul.f32 %v1506_v16, %v3225_v46  ;;  %v1254_v33 = vstv %s3324_s22  ;;  %s2406_s22 = sld [smem:[#allocation11 + $0x4e]] }
 0x234   : > { %1398 = vrot.lane.b32.xlu2 %v1391_v62, %s2676_s2 }
 0x235   : > { %v1088_v43 = vpop.permute.xlu1 %1087  ;;  %v1092_v34 = vpop.permute.xlu0 %1091 }
 0x236   : > { %v1096_v55 = vadd.f32 %v1088_v43, %v1076_v8  ;;  %v1148_v22 = vpop.permute.xlu2 %1147  ;;  %v1098_v18 = vadd.f32 %v1092_v34, %v1078_v28  ;;  %v1256_v43 = vmul.f32 %v1254_v33, %v3225_v46 }
 0x237   : > { %v1155_v54 = vadd.f32 %v1148_v22, %v1135_v30  ;;  %v1529_v30 = vmul.f32 %v1526_v11, %v3262_v59 }
 0x238   : > { %v1103_v37 = vrot.slane %v1096_v55, 5  ;;  %v1106_v39 = vrot.slane %v1098_v18, 5 }
 0x23a   : > { %v1105_v42 = vsel %vm1102_vm9, %v1103_v37, %v1104_v4  ;;  %v1107_v35 = vsel %vm1102_vm9, %v1104_v4, %v1106_v39  ;;  %v1547_v4 = vmul.f32 %v1546_v36, %v3204_v38  ;;  %v1549_v37 = vmul.f32 %v1546_v36, %v3262_v59 }
 0x23b   : > { %v3299_v47 = vadd.f32 %v1105_v42, %v3246_v31  ;;  %1440 = vrot.lane.b32.xlu0 %v1432_v41, %s2677_s27  ;;  %1436 = vrot.lane.b32.xlu1 %v1430_v40, %s2677_s27  ;;  %v3307_v31 = vadd.f32 %v1107_v35, %v3249_v32  ;;  %v1486_v32 = vstv %s2392_s8  ;;  %v1528_v39 = vmul.f32 %v1526_v11, %v3225_v46  ;;  %s2402_s8 = sld [smem:[#allocation11 + $0x4a]] }
 0x23c   : > { %1418 = vrot.lane.b32.xlu2 %v1411_v45, %s2678_s28  ;;  %v1487_v10 = vmul.f32 %v1486_v32, %v3204_v38  ;;  %v1489_v61 = vmul.f32 %v1486_v32, %v3262_v59  ;;  %v1488_v20 = vmul.f32 %v1486_v32, %v3225_v46 }
 0x23d   : > { %v1126_v5 = vpop.permute.xlu1 %1125  ;;  %v1130_v19 = vpop.permute.xlu0 %1129 }
 0x23e   : > { %v1134_v51 = vadd.f32 %v1126_v5, %v1114_v48  ;;  %v1168_v52 = vpop.permute.xlu2 %1167  ;;  %v1136_v58 = vadd.f32 %v1130_v19, %v1116_v50  ;;  %v1566_v48 = vstv %s2396_s30  ;;  %s2407_s30 = sld [smem:[#allocation11 + $0x4f]] }
 0x23f   : > { %v1175_v60 = vadd.f32 %v1168_v52, %v1155_v54  ;;  %v1569_v52 = vmul.f32 %v1566_v48, %v3262_v59 }
 0x243   : > { %1456 = vrot.lane.b32.xlu1 %v1450_v63, %s2679_s7  ;;  %1460 = vrot.lane.b32.xlu0 %v1452_v0, %s2679_s7 }
 0x244   : > { %1438 = vrot.lane.b32.xlu2 %v1431_v1, %s2677_s27  ;;  %v1255_v1 = vmul.f32 %v1254_v33, %v3204_v38 }
 0x245   : > { %v1146_v12 = vpop.permute.xlu1 %1145  ;;  %v1150_v57 = vpop.permute.xlu0 %1149 }
 0x246   : > { %v1154_v2 = vadd.f32 %v1146_v12, %v1134_v51  ;;  %v1188_v6 = vpop.permute.xlu2 %1187  ;;  %v1156_v44 = vadd.f32 %v1150_v57, %v1136_v58  ;;  %v1567_v51 = vmul.f32 %v1566_v48, %v3204_v38 }
 0x247   : > { %v1195_v49 = vadd.f32 %v1188_v6, %v1175_v60 }
 0x24b   : > { %1493 = vrot.lane.b32.xlu1 %v1487_v10, %s2675_s11  ;;  %1497 = vrot.lane.b32.xlu0 %v1489_v61, %s2675_s11  ;;  %v1568_v61 = vmul.f32 %v1566_v48, %v3225_v46 }
 0x24c   : > { %1458 = vrot.lane.b32.xlu2 %v1451_v3, %s2679_s7 }
 0x24d   : > { %v1166_v14 = vpop.permute.xlu1 %1165  ;;  %v1170_v15 = vpop.permute.xlu0 %1169 }
 0x24e   : > { %v1174_v13 = vadd.f32 %v1166_v14, %v1154_v2  ;;  %v1208_v53 = vpop.permute.xlu2 %1207  ;;  %v1176_v56 = vadd.f32 %v1170_v15, %v1156_v44  ;;  %v1586_v44 = vstv %s2397_s4  ;;  %s2408_s4 = sld [smem:[#allocation11 + $0x50]] }
 0x24f   : > { %v1215_v17 = vadd.f32 %v1208_v53, %v1195_v49  ;;  %v1587_v49 = vmul.f32 %v1586_v44, %v3204_v38  ;;  %v1589_v10 = vmul.f32 %v1586_v44, %v3262_v59 }
 0x253   : > { %1513 = vrot.lane.b32.xlu1 %v1507_v21, %s2674_s6  ;;  %1517 = vrot.lane.b32.xlu0 %v1509_v23, %s2674_s6  ;;  %v1344_v21 = vstv %s2384_s13  ;;  %s2410_s13 = sld [smem:[#allocation11 + $0x52]] }
 0x254   : > { %1495 = vrot.lane.b32.xlu2 %v1488_v20, %s2675_s11 }
 0x255   : > { %v1186_v24 = vpop.permute.xlu1 %1185  ;;  %v1190_v25 = vpop.permute.xlu0 %1189 }
 0x256   : > { %v1194_v26 = vadd.f32 %v1186_v24, %v1174_v13  ;;  %v1228_v7 = vpop.permute.xlu2 %1227  ;;  %v1196_v8 = vadd.f32 %v1190_v25, %v1176_v56  ;;  %v1623_v13 = vstv %s2399_s12  ;;  %v1346_v24 = vmul.f32 %v1344_v21, %v3225_v46  ;;  %s2409_s12 = sld [smem:[#allocation11 + $0x51]] }
 0x257   : > { %v1235_v28 = vadd.f32 %v1228_v7, %v1215_v17  ;;  %v1624_v56 = vmul.f32 %v1623_v13, %v3204_v38  ;;  %v1626_v16 = vmul.f32 %v1623_v13, %v3262_v59  ;;  %v1588_v17 = vmul.f32 %v1586_v44, %v3225_v46 }
 0x258   : > { %v1625_v33 = vmul.f32 %v1623_v13, %v3225_v46 }
 0x259   : > { %v1242_v50 = vrot.slane %v1235_v28, 6 }
 0x25b   : > { %1533 = vrot.lane.b32.xlu1 %v1527_v29, %s2676_s2  ;;  %1537 = vrot.lane.b32.xlu0 %v1529_v30, %s2676_s2 }
 0x25c   : > { %1515 = vrot.lane.b32.xlu2 %v1508_v27, %s2674_s6 }
 0x25d   : > { %v1206_v62 = vpop.permute.xlu1 %1205  ;;  %v1210_v34 = vpop.permute.xlu0 %1209 }
 0x25e   : > { %v1214_v55 = vadd.f32 %v1206_v62, %v1194_v26  ;;  %v1266_v22 = vpop.permute.xlu2 %1265  ;;  %v1216_v18 = vadd.f32 %v1210_v34, %v1196_v8  ;;  %v1643_v8 = vstv %s2400_s20  ;;  %s2411_s20 = sld [smem:[#allocation11 + $0x53]] }
 0x25f   : > { %v1270_v54 = vadd.f32 %v1266_v22, %v1256_v43  ;;  %v1644_v29 = vmul.f32 %v1643_v8, %v3204_v38  ;;  %v1646_v30 = vmul.f32 %v1643_v8, %v3262_v59 }
 0x263   : > { %1553 = vrot.lane.b32.xlu1 %v1547_v4, %s2678_s28  ;;  %1557 = vrot.lane.b32.xlu0 %v1549_v37, %s2678_s28 }
 0x264   : > { %1535 = vrot.lane.b32.xlu2 %v1528_v39, %s2676_s2 }
 0x265   : > { %v1226_v41 = vpop.permute.xlu1 %1225  ;;  %v1230_v40 = vpop.permute.xlu0 %1229 }
 0x266   : > { %v1234_v42 = vadd.f32 %v1226_v41, %v1214_v55  ;;  %v1292_v35 = vpop.permute.xlu2 %1291  ;;  %v1236_v45 = vadd.f32 %v1230_v40, %v1216_v18  ;;  %v1663_v18 = vstv %s2401_s29  ;;  %v1645_v41 = vmul.f32 %v1643_v8, %v3225_v46  ;;  %s2413_s29 = sld [smem:[#allocation11 + $0x55]] }
 0x267   : > { %v1664_v4 = vmul.f32 %v1663_v18, %v3204_v38  ;;  %v1666_v37 = vmul.f32 %v1663_v18, %v3262_v59  ;;  %v1345_v40 = vmul.f32 %v1344_v21, %v3204_v38  ;;  %v1481_v8 = vstv %s2391_s24  ;;  %s2421_s24 = sld [smem:[#allocation11 + $0x5d]] }
 0x268   : > { %v1241_v5 = vrot.slane %v1234_v42, 6  ;;  %v1244_v19 = vrot.slane %v1236_v45, 6  ;;  %v1347_v42 = vmul.f32 %v1344_v21, %v3262_v59 }
 0x26a   : > { %v1243_v58 = vsel %vm1240_vm10, %v1241_v5, %v1242_v50  ;;  %v1245_v60 = vsel %vm1240_vm10, %v1242_v50, %v1244_v19  ;;  %v1683_v19 = vstv %s2402_s8  ;;  %s2398_s8 = sld [smem:[#allocation11 + $0x46]] }
 0x26b   : > { %1573 = vrot.lane.b32.xlu1 %v1567_v51, %s2677_s27  ;;  %1577 = vrot.lane.b32.xlu0 %v1569_v52, %s2677_s27  ;;  %v1248_v63 = vadd.f32 %v1243_v58, %v3299_v47  ;;  %v1249_v0 = vadd.f32 %v1245_v60, %v3307_v31  ;;  %v1684_v52 = vmul.f32 %v1683_v19, %v3204_v38 }
 0x26c   : > { %1555 = vrot.lane.b32.xlu2 %v1548_v9, %s2678_s28  ;;  %v1686_v58 = vmul.f32 %v1683_v19, %v3262_v59  ;;  %v1665_v9 = vmul.f32 %v1663_v18, %v3225_v46 }
 0x26d   : > { %v1264_v12 = vpop.permute.xlu1 %1263  ;;  %v1278_v57 = vpop.permute.xlu0 %1277 }
 0x26e   : > { %v1269_v2 = vadd.f32 %v1264_v12, %v1255_v1  ;;  %v1308_v6 = vpop.permute.xlu2 %1307 }
 0x270   : > { %v1283_v32 = vadd.f32 %v1278_v57, %v1269_v2  ;;  %v1703_v57 = vstv %s2403_s21  ;;  %s2414_s21 = sld [smem:[#allocation11 + $0x56]] }
 0x271   : > { %v1706_v44 = vmul.f32 %v1703_v57, %v3262_v59 }
 0x272   : > { %v1297_v47 = vadd.f32 %v1292_v35, %v1283_v32  ;;  %v1685_v32 = vmul.f32 %v1683_v19, %v3225_v46 }
 0x273   : > { %1593 = vrot.lane.b32.xlu1 %v1587_v49, %s2679_s7  ;;  %1597 = vrot.lane.b32.xlu0 %v1589_v10, %s2679_s7 }
 0x274   : > { %1575 = vrot.lane.b32.xlu2 %v1568_v61, %s2677_s27 }
 0x275   : > { %v1280_v31 = vpop.permute.xlu1 %1279  ;;  %v1294_v3 = vpop.permute.xlu0 %1293 }
 0x276   : > { %v1284_v14 = vadd.f32 %v1280_v31, %v1270_v54  ;;  %v1334_v15 = vpop.permute.xlu2 %1333 }
 0x278   : > { %v1298_v53 = vadd.f32 %v1294_v3, %v1284_v14  ;;  %v1723_v3 = vstv %s2404_s10  ;;  %s2415_s10 = sld [smem:[#allocation11 + $0x57]] }
 0x279   : > { %v1726_v13 = vmul.f32 %v1723_v3, %v3262_v59 }
 0x27a   : > { %v1312_v23 = vadd.f32 %v1308_v6, %v1298_v53  ;;  %v1704_v6 = vmul.f32 %v1703_v57, %v3204_v38  ;;  %v1705_v53 = vmul.f32 %v1703_v57, %v3225_v46 }
 0x27b   : > { %1630 = vrot.lane.b32.xlu1 %v1624_v56, %s2675_s11  ;;  %1634 = vrot.lane.b32.xlu0 %v1626_v16, %s2675_s11 }
 0x27c   : > { %1595 = vrot.lane.b32.xlu2 %v1588_v17, %s2679_s7 }
 0x27d   : > { %v1306_v20 = vpop.permute.xlu1 %1305  ;;  %v1320_v25 = vpop.permute.xlu0 %1319 }
 0x27e   : > { %v1311_v26 = vadd.f32 %v1306_v20, %v1297_v47  ;;  %v1359_v7 = vpop.permute.xlu2 %1358  ;;  %v1760_v20 = vstv %s2406_s22  ;;  %s2420_s22 = sld [smem:[#allocation11 + $0x5c]] }
 0x27f   : > { %v1366_v11 = vadd.f32 %v1359_v7, %v1346_v24  ;;  %v1725_v7 = vmul.f32 %v1723_v3, %v3225_v46  ;;  %v1762_v18 = vmul.f32 %v1760_v20, %v3225_v46 }
 0x280   : > { %v1325_v28 = vadd.f32 %v1320_v25, %v1311_v26  ;;  %v1761_v25 = vmul.f32 %v1760_v20, %v3204_v38  ;;  %v1763_v26 = vmul.f32 %v1760_v20, %v3262_v59  ;;  %v1860_v20 = vstv %s2411_s20  ;;  %s2425_s20 = sld [smem:[#allocation11 + $0x61]] }
 0x282   : > { %v1339_v27 = vadd.f32 %v1334_v15, %v1325_v28  ;;  %v1724_v15 = vmul.f32 %v1723_v3, %v3204_v38  ;;  %v1483_v28 = vmul.f32 %v1481_v8, %v3225_v46  ;;  %v1840_v3 = vstv %s2410_s13  ;;  %s2418_s13 = sld [smem:[#allocation11 + $0x5a]] }
 0x283   : > { %1650 = vrot.lane.b32.xlu1 %v1644_v29, %s2674_s6  ;;  %1654 = vrot.lane.b32.xlu0 %v1646_v30, %s2674_s6 }
 0x284   : > { %v3372_v62 = vadd.f32 %v1339_v27, %v1248_v63  ;;  %1632 = vrot.lane.b32.xlu2 %v1625_v33, %s2675_s11 }
 0x285   : > { %v1322_v43 = vpop.permute.xlu1 %1321  ;;  %v1336_v34 = vpop.permute.xlu0 %1335 }
 0x286   : > { %v1326_v55 = vadd.f32 %v1322_v43, %v1312_v23  ;;  %v1379_v22 = vpop.permute.xlu2 %1378  ;;  %v1780_v43 = vstv %s2407_s30  ;;  %s2416_s30 = sld [smem:[#allocation11 + $0x58]] }
 0x287   : > { %v1386_v36 = vadd.f32 %v1379_v22, %v1366_v11  ;;  %v1783_v22 = vmul.f32 %v1780_v43, %v3262_v59 }
 0x288   : > { %v1340_v54 = vadd.f32 %v1336_v34, %v1326_v55  ;;  %v1781_v55 = vmul.f32 %v1780_v43, %v3204_v38 }
 0x28a   : > { %v3377_v39 = vadd.f32 %v1340_v54, %v1249_v0 }
 0x28b   : > { %1670 = vrot.lane.b32.xlu1 %v1664_v4, %s2676_s2  ;;  %1674 = vrot.lane.b32.xlu0 %v1666_v37, %s2676_s2 }
 0x28c   : > { %1652 = vrot.lane.b32.xlu2 %v1645_v41, %s2674_s6 }
 0x28d   : > { %v1357_v35 = vpop.permute.xlu1 %1356  ;;  %v1361_v45 = vpop.permute.xlu0 %1360 }
 0x28e   : > { %v1365_v48 = vadd.f32 %v1357_v35, %v1345_v40  ;;  %v1399_v50 = vpop.permute.xlu2 %1398  ;;  %v1367_v5 = vadd.f32 %v1361_v45, %v1347_v42  ;;  %v1800_v40 = vstv %s2408_s4  ;;  %s2422_s4 = sld [smem:[#allocation11 + $0x5e]] }
 0x28f   : > { %v1406_v51 = vadd.f32 %v1399_v50, %v1386_v36  ;;  %v1801_v50 = vmul.f32 %v1800_v40, %v3204_v38 }
 0x293   : > { %1690 = vrot.lane.b32.xlu1 %v1684_v52, %s2678_s28  ;;  %1694 = vrot.lane.b32.xlu0 %v1686_v58, %s2678_s28  ;;  %v1782_v52 = vmul.f32 %v1780_v43, %v3225_v46 }
 0x294   : > { %1672 = vrot.lane.b32.xlu2 %v1665_v9, %s2676_s2 }
 0x295   : > { %v1377_v60 = vpop.permute.xlu1 %1376  ;;  %v1381_v63 = vpop.permute.xlu0 %1380 }
 0x296   : > { %v1385_v0 = vadd.f32 %v1377_v60, %v1365_v48  ;;  %v1419_v1 = vpop.permute.xlu2 %1418  ;;  %v1387_v12 = vadd.f32 %v1381_v63, %v1367_v5  ;;  %v1803_v5 = vmul.f32 %v1800_v40, %v3262_v59  ;;  %v1482_v60 = vmul.f32 %v1481_v8, %v3204_v38 }
 0x297   : > { %v1426_v2 = vadd.f32 %v1419_v1, %v1406_v51  ;;  %v1484_v63 = vmul.f32 %v1481_v8, %v3262_v59 }
 0x29b   : > { %1710 = vrot.lane.b32.xlu1 %v1704_v6, %s2677_s27  ;;  %1714 = vrot.lane.b32.xlu0 %v1706_v44, %s2677_s27 }
 0x29c   : > { %1692 = vrot.lane.b32.xlu2 %v1685_v32, %s2678_s28  ;;  %v1802_v32 = vmul.f32 %v1800_v40, %v3225_v46  ;;  %v1917_v40 = vstv %s2414_s21 }
 0x29d   : > { %v1397_v49 = vpop.permute.xlu1 %1396  ;;  %v1401_v10 = vpop.permute.xlu0 %1400 }
 0x29e   : > { %v1405_v61 = vadd.f32 %v1397_v49, %v1385_v0  ;;  %v1439_v47 = vpop.permute.xlu2 %1438  ;;  %v1407_v31 = vadd.f32 %v1401_v10, %v1387_v12 }
 0x29f   : > { %v1446_v14 = vadd.f32 %v1439_v47, %v1426_v2 }
 0x2a3   : > { %1730 = vrot.lane.b32.xlu1 %v1724_v15, %s2679_s7  ;;  %1734 = vrot.lane.b32.xlu0 %v1726_v13, %s2679_s7  ;;  %v1841_v15 = vmul.f32 %v1840_v3, %v3204_v38  ;;  %v1843_v13 = vmul.f32 %v1840_v3, %v3262_v59 }
 0x2a4   : > { %1712 = vrot.lane.b32.xlu2 %v1705_v53, %s2677_s27 }
 0x2a5   : > { %v1417_v56 = vpop.permute.xlu1 %1416  ;;  %v1421_v16 = vpop.permute.xlu0 %1420 }
 0x2a6   : > { %v1425_v17 = vadd.f32 %v1417_v56, %v1405_v61  ;;  %v1459_v21 = vpop.permute.xlu2 %1458  ;;  %v1427_v23 = vadd.f32 %v1421_v16, %v1407_v31 }
 0x2a7   : > { %v1466_v24 = vadd.f32 %v1459_v21, %v1446_v14 }
 0x2a9   : > { %v1472_v35 = vrot.slane %v1466_v24, 1 }
 0x2ab   : > { %1767 = vrot.lane.b32.xlu1 %v1761_v25, %s2675_s11  ;;  %1771 = vrot.lane.b32.xlu0 %v1763_v26, %s2675_s11  ;;  %v1861_v25 = vmul.f32 %v1860_v20, %v3204_v38  ;;  %v1863_v26 = vmul.f32 %v1860_v20, %v3262_v59 }
 0x2ac   : > { %1732 = vrot.lane.b32.xlu2 %v1725_v7, %s2679_s7  ;;  %v1842_v7 = vmul.f32 %v1840_v3, %v3225_v46 }
 0x2ad   : > { %v1437_v11 = vpop.permute.xlu1 %1436  ;;  %v1441_v29 = vpop.permute.xlu0 %1440 }
 0x2ae   : > { %v1445_v30 = vadd.f32 %v1437_v11, %v1425_v17  ;;  %v1496_v27 = vpop.permute.xlu2 %1495  ;;  %v1447_v33 = vadd.f32 %v1441_v29, %v1427_v23 }
 0x2af   : > { %v1503_v34 = vadd.f32 %v1496_v27, %v1483_v28  ;;  %v1897_v27 = vstv %s2413_s29  ;;  %s2434_s29 = sshll.u32 %s2658_s17, 4 }
 0x2b0   : > { %v1898_v43 = vmul.f32 %v1897_v27, %v3204_v38 }
 0x2b3   : > { %1787 = vrot.lane.b32.xlu1 %v1781_v55, %s2674_s6  ;;  %1791 = vrot.lane.b32.xlu0 %v1783_v22, %s2674_s6  ;;  %v1862_v55 = vmul.f32 %v1860_v20, %v3225_v46  ;;  %v1618_v22 = vstv %s2398_s8  ;;  %v2054_v20 = vstv %s2421_s24 }
 0x2b4   : > { %1769 = vrot.lane.b32.xlu2 %v1762_v18, %s2675_s11 }
 0x2b5   : > { %v1457_v36 = vpop.permute.xlu1 %1456  ;;  %v1461_v54 = vpop.permute.xlu0 %1460 }
 0x2b6   : > { %v1465_v4 = vadd.f32 %v1457_v36, %v1445_v30  ;;  %v1516_v37 = vpop.permute.xlu2 %1515  ;;  %v1467_v41 = vadd.f32 %v1461_v54, %v1447_v33  ;;  %v1620_v36 = vmul.f32 %v1618_v22, %v3225_v46 }
 0x2b7   : > { %v1523_v42 = vadd.f32 %v1516_v37, %v1503_v34  ;;  %v1900_v34 = vmul.f32 %v1897_v27, %v3262_v59 }
 0x2b8   : > { %v1471_v45 = vrot.slane %v1465_v4, 1  ;;  %v1474_v48 = vrot.slane %v1467_v41, 1 }
 0x2ba   : > { %v1473_v19 = vsel %vm550_vm5, %v1471_v45, %v1472_v35  ;;  %v1475_v51 = vsel %vm550_vm5, %v1472_v35, %v1474_v48  ;;  %v1918_v35 = vmul.f32 %v1917_v40, %v3204_v38  ;;  %v1920_v45 = vmul.f32 %v1917_v40, %v3262_v59 }
 0x2bb   : > { %v3422_v58 = vadd.f32 %v1473_v19, %v3372_v62  ;;  %v3425_v9 = vadd.f32 %v1475_v51, %v3377_v39  ;;  %1807 = vrot.lane.b32.xlu1 %v1801_v50, %s2676_s2  ;;  %1811 = vrot.lane.b32.xlu0 %v1803_v5, %s2676_s2  ;;  %v1820_v62 = vstv %s2409_s12  ;;  %v1899_v48 = vmul.f32 %v1897_v27, %v3225_v46  ;;  %s2405_s12 = sld [smem:[#allocation11 + $0x4d]] }
 0x2bc   : > { %1789 = vrot.lane.b32.xlu2 %v1782_v52, %s2674_s6  ;;  %v1821_v39 = vmul.f32 %v1820_v62, %v3204_v38  ;;  %v1823_v44 = vmul.f32 %v1820_v62, %v3262_v59  ;;  %v1822_v53 = vmul.f32 %v1820_v62, %v3225_v46  ;;  %v3464_v62 = vld [vmem:[#allocation5] sm:$0xff] }
 0x2bd   : > { %v1494_v0 = vpop.permute.xlu1 %1493  ;;  %v1498_v1 = vpop.permute.xlu0 %1497 }
 0x2be   : > { %v1502_v12 = vadd.f32 %v1494_v0, %v1482_v60  ;;  %v1536_v57 = vpop.permute.xlu2 %1535  ;;  %v1504_v2 = vadd.f32 %v1498_v1, %v1484_v63  ;;  %v1937_v60 = vstv %s2415_s10  ;;  %v2034_v63 = vstv %s2420_s22  ;;  %s2217_s10 = scalar_lea.hbm %s3610_s3, %s2434_s29 }
 0x2bf   : > { %v1543_v6 = vadd.f32 %v1536_v57, %v1523_v42  ;;  %s2220_s17 = sshll.u32 %s2217_s10, 4  ;;  %s2221_s17 = int_to_ptr.hbm [resolvable:$true] %s2220_s17 }
 0x2c3   : > { %1827 = vrot.lane.b32.xlu1 %v1821_v39, %s2678_s28  ;;  %1831 = vrot.lane.b32.xlu0 %v1823_v44, %s2678_s28 }
 0x2c4   : > { %1809 = vrot.lane.b32.xlu2 %v1802_v32, %s2676_s2  ;;  %v1919_v32 = vmul.f32 %v1917_v40, %v3225_v46 }
 0x2c5   : > { %v1514_v49 = vpop.permute.xlu1 %1513  ;;  %v1518_v10 = vpop.permute.xlu0 %1517 }
 0x2c6   : > { %v1522_v61 = vadd.f32 %v1514_v49, %v1502_v12  ;;  %v1556_v47 = vpop.permute.xlu2 %1555  ;;  %v1524_v31 = vadd.f32 %v1518_v10, %v1504_v2  ;;  %v1938_v2 = vmul.f32 %v1937_v60, %v3204_v38  ;;  %v1619_v38 = vmul.f32 %v3464_v62, %v1618_v22 }
 0x2c7   : > { %v1563_v14 = vadd.f32 %v1556_v47, %v1543_v6  ;;  %v2035_v6 = vmul.f32 %v3464_v62, %v2034_v63 }
 0x2cb   : > { %1847 = vrot.lane.b32.xlu1 %v1841_v15, %s2677_s27  ;;  %1851 = vrot.lane.b32.xlu0 %v1843_v13, %s2677_s27  ;;  %v1940_v13 = vmul.f32 %v1937_v60, %v3262_v59 }
 0x2cc   : > { %1829 = vrot.lane.b32.xlu2 %v1822_v53, %s2678_s28  ;;  %v1939_v53 = vmul.f32 %v1937_v60, %v3225_v46 }
 0x2cd   : > { %v1534_v56 = vpop.permute.xlu1 %1533  ;;  %v1538_v16 = vpop.permute.xlu0 %1537 }
 0x2ce   : > { %v1542_v17 = vadd.f32 %v1534_v56, %v1522_v61  ;;  %v1576_v21 = vpop.permute.xlu2 %1575  ;;  %v1544_v23 = vadd.f32 %v1538_v16, %v1524_v31  ;;  %v1621_v61 = vmul.f32 %v1618_v22, %v3262_v59 }
 0x2cf   : > { %v1583_v24 = vadd.f32 %v1576_v21, %v1563_v14 }
 0x2d3   : > { %1867 = vrot.lane.b32.xlu1 %v1861_v25, %s2679_s7  ;;  %1871 = vrot.lane.b32.xlu0 %v1863_v26, %s2679_s7  ;;  %v2055_v25 = vmul.f32 %v3464_v62, %v2054_v20  ;;  %v2057_v26 = vmul.f32 %v2054_v20, %v3262_v59 }
 0x2d4   : > { %1849 = vrot.lane.b32.xlu2 %v1842_v7, %s2677_s27 }
 0x2d5   : > { %v1554_v8 = vpop.permute.xlu1 %1553  ;;  %v1558_v11 = vpop.permute.xlu0 %1557 }
 0x2d6   : > { %v1562_v28 = vadd.f32 %v1554_v8, %v1542_v17  ;;  %v1596_v29 = vpop.permute.xlu2 %1595  ;;  %v1564_v30 = vadd.f32 %v1558_v11, %v1544_v23 }
 0x2d7   : > { %v1603_v33 = vadd.f32 %v1596_v29, %v1583_v24 }
 0x2d9   : > { %v1609_v1 = vrot.slane %v1603_v33, 2 }
 0x2db   : > { %1904 = vrot.lane.b32.xlu1 %v1898_v43, %s2675_s11  ;;  %1908 = vrot.lane.b32.xlu0 %v1900_v34, %s2675_s11  ;;  %v3495_v34 = vld [vmem:[#allocation5 + $0x8] sm:$0xff] }
 0x2dc   : > { %1869 = vrot.lane.b32.xlu2 %v1862_v55, %s2679_s7  ;;  %v2056_v55 = vmul.f32 %v3495_v34, %v2054_v20 }
 0x2dd   : > { %v1574_v18 = vpop.permute.xlu1 %1573  ;;  %v1578_v54 = vpop.permute.xlu0 %1577 }
 0x2de   : > { %v1582_v4 = vadd.f32 %v1574_v18, %v1562_v28  ;;  %v1633_v37 = vpop.permute.xlu2 %1632  ;;  %v1584_v41 = vadd.f32 %v1578_v54, %v1564_v30  ;;  %v1957_v30 = vstv %s2416_s30  ;;  %s2206_s30 = scalar_lea.sflag [#allocation9], %s2806_s9 }
 0x2df   : > { %v1640_v42 = vadd.f32 %v1633_v37, %v1620_v36  ;;  %v1958_v33 = vmul.f32 %v3464_v62, %v1957_v30  ;;  %v1960_v43 = vmul.f32 %v1957_v30, %v3262_v59  ;;  %v2074_v37 = vstv %s2422_s4  ;;  %s2594_s4 = sshra.s32 %s2221_s17, 4  ;;  %s2595_s4 = int_to_ptr.hbm [resolvable:$true] %s2594_s4 }
 0x2e0   : > { %v2075_v40 = vmul.f32 %v3464_v62, %v2074_v37  ;;  %p2601_p11 = scmp.lt.s32.totalorder %s2595_s4, %s3610_s3 }
 0x2e3   : > { %1924 = vrot.lane.b32.xlu1 %v1918_v35, %s2674_s6  ;;  %1928 = vrot.lane.b32.xlu0 %v1920_v45, %s2674_s6  ;;  %v1959_v35 = vmul.f32 %v3495_v34, %v1957_v30  ;;  %v1755_v45 = vstv %s2405_s12  ;;  %s2596_s12 = scalar_lea.hbm %s2595_s4, 16 }
 0x2e4   : > { %1906 = vrot.lane.b32.xlu2 %v1899_v48, %s2675_s11  ;;  %p2597_p3 = scmp.ne.s32.totalorder %s2595_s4, %s2596_s12 }
 0x2e5   : > { %v1594_v50 = vpop.permute.xlu1 %1593  ;;  %v1598_v5 = vpop.permute.xlu0 %1597 }
 0x2e6   : > { %v1602_v19 = vadd.f32 %v1594_v50, %v1582_v4  ;;  %v1653_v51 = vpop.permute.xlu2 %1652  ;;  %v1604_v52 = vadd.f32 %v1598_v5, %v1584_v41  ;;  %v1757_v50 = vmul.f32 %v3495_v34, %v1755_v45  ;;  %p2598_p5 = pnand %p2597_p3, %p2757_p8 }
 0x2e7   : > { %v1660_v0 = vadd.f32 %v1653_v51, %v1640_v42  ;;  %v2077_v42 = vmul.f32 %v2074_v37, %v3262_v59 }
 0x2e8   : > { %v1608_v12 = vrot.slane %v1602_v19, 2  ;;  %v1611_v57 = vrot.slane %v1604_v52, 2  ;;  %p2599_p7 = pneg %p2598_p5 }
 0x2ea   : > { %v1610_v39 = vsel %vm688_vm6, %v1608_v12, %v1609_v1  ;;  %v1612_v44 = vsel %vm688_vm6, %v1609_v1, %v1611_v57  ;;  %v2076_v12 = vmul.f32 %v3495_v34, %v2074_v37  ;;  %v2134_v37 = vstv %s2425_s20 }
 0x2eb   : > { %v3471_v49 = vadd.f32 %v1610_v39, %v3422_v58  ;;  %v3474_v10 = vadd.f32 %v1612_v44, %v3425_v9  ;;  %1944 = vrot.lane.b32.xlu1 %v1938_v2, %s2676_s2  ;;  %2041 = vrot.lane.b32.xlu0 %v2035_v6, %s2675_s11  ;;  %v2036_v9 = vmul.f32 %v2034_v63, %v3225_v46 }
 0x2ec   : > { %1926 = vrot.lane.b32.xlu2 %v1919_v32, %s2674_s6  ;;  %v2037_v46 = vmul.f32 %v2034_v63, %v3262_v59 }
 0x2ed   : > { %v1631_v47 = vpop.permute.xlu1 %1630  ;;  %v1635_v31 = vpop.permute.xlu0 %1634 }
 0x2ee   : > { %v1639_v3 = vadd.f32 %v1631_v47, %v1619_v38  ;;  %v1673_v14 = vpop.permute.xlu2 %1672  ;;  %v1641_v15 = vadd.f32 %v1635_v31, %v1621_v61 }
 0x2ef   : > { %v1680_v58 = vadd.f32 %v1673_v14, %v1660_v0 }
 0x2f3   : > { %2043 = vrot.lane.b32.xlu1 %v2036_v9, %s2675_s11  ;;  %1948 = vrot.lane.b32.xlu0 %v1940_v13, %s2676_s2 }
 0x2f4   : > { %1946 = vrot.lane.b32.xlu2 %v1939_v53, %s2676_s2 }
 0x2f5   : > { %v1651_v56 = vpop.permute.xlu1 %1650  ;;  %v1655_v16 = vpop.permute.xlu0 %1654 }
 0x2f6   : > { %v1659_v17 = vadd.f32 %v1651_v56, %v1639_v3  ;;  %v1693_v21 = vpop.permute.xlu2 %1692  ;;  %v1661_v23 = vadd.f32 %v1655_v16, %v1641_v15  ;;  %v3515_v3 = vld [vmem:[#allocation5 + $0x10] sm:$0x3f]  ;;  %v1756_v56 = vmul.f32 %v3464_v62, %v1755_v45 }
 0x2f7   : > { %v1700_v24 = vadd.f32 %v1693_v21, %v1680_v58  ;;  %v1758_v16 = vmul.f32 %v3515_v3, %v1755_v45 }
 0x2fb   : > { %2061 = vrot.lane.b32.xlu1 %v2055_v25, %s2674_s6  ;;  %2065 = vrot.lane.b32.xlu0 %v2057_v26, %s2674_s6 }
 0x2fc   : > { %2045 = vrot.lane.b32.xlu2 %v2037_v46, %s2675_s11  ;;  %s2417_s11 = sld [smem:[#allocation11 + $0x59]] }
 0x2fd   : > { %v1671_v7 = vpop.permute.xlu1 %1670  ;;  %v1675_v8 = vpop.permute.xlu0 %1674 }
 0x2fe   : > { %v1679_v11 = vadd.f32 %v1671_v7, %v1659_v17  ;;  %v1713_v28 = vpop.permute.xlu2 %1712  ;;  %v1681_v29 = vadd.f32 %v1675_v8, %v1661_v23 }
 0x2ff   : > { %v1720_v27 = vadd.f32 %v1713_v28, %v1700_v24 }
 0x302   : > { %v1977_v60 = vstv %s2417_s11 }
 0x303   : > { %1964 = vrot.lane.b32.xlu1 %v1958_v33, %s2678_s28  ;;  %1968 = vrot.lane.b32.xlu0 %v1960_v43, %s2678_s28  ;;  %v1978_v0 = vmul.f32 %v3464_v62, %v1977_v60  ;;  %v1980_v1 = vmul.f32 %v1977_v60, %v3262_v59  ;;  %v1979_v9 = vmul.f32 %v3495_v34, %v1977_v60 }
 0x304   : > { %2063 = vrot.lane.b32.xlu2 %v2056_v55, %s2674_s6  ;;  %s2423_s6 = sld [smem:[#allocation11 + $0x5f]] }
 0x305   : > { %v1691_v22 = vpop.permute.xlu1 %1690  ;;  %v1695_v18 = vpop.permute.xlu0 %1694 }
 0x306   : > { %v1699_v36 = vadd.f32 %v1691_v22, %v1679_v11  ;;  %v1733_v54 = vpop.permute.xlu2 %1732  ;;  %v1701_v4 = vadd.f32 %v1695_v18, %v1681_v29 }
 0x307   : > { %v1740_v41 = vadd.f32 %v1733_v54, %v1720_v27 }
 0x309   : > { %v1746_v61 = vrot.slane %v1740_v41, 3 }
 0x30a   : > { %v2094_v32 = vstv %s2423_s6 }
 0x30b   : > { %2081 = vrot.lane.b32.xlu1 %v2075_v40, %s2676_s2  ;;  %2085 = vrot.lane.b32.xlu0 %v2077_v42, %s2676_s2  ;;  %v2095_v59 = vmul.f32 %v3464_v62, %v2094_v32  ;;  %v2097_v14 = vmul.f32 %v3515_v3, %v2094_v32  ;;  %v2096_v46 = vmul.f32 %v3495_v34, %v2094_v32 }
 0x30c   : > { %1966 = vrot.lane.b32.xlu2 %v1959_v35, %s2678_s28  ;;  %v2135_v40 = vmul.f32 %v3464_v62, %v2134_v37  ;;  %v2137_v42 = vmul.f32 %v3515_v3, %v2134_v37 }
 0x30d   : > { %v1711_v48 = vpop.permute.xlu1 %1710  ;;  %v1715_v5 = vpop.permute.xlu0 %1714 }
 0x30e   : > { %v1719_v19 = vadd.f32 %v1711_v48, %v1699_v36  ;;  %v1770_v51 = vpop.permute.xlu2 %1769  ;;  %v1721_v52 = vadd.f32 %v1715_v5, %v1701_v4 }
 0x30f   : > { %v1777_v63 = vadd.f32 %v1770_v51, %v1757_v50 }
 0x313   : > { %1984 = vrot.lane.b32.xlu1 %v1978_v0, %s2677_s27  ;;  %1988 = vrot.lane.b32.xlu0 %v1980_v1, %s2677_s27 }
 0x314   : > { %2083 = vrot.lane.b32.xlu2 %v2076_v12, %s2676_s2  ;;  %s2424_s2 = sld [smem:[#allocation11 + $0x60]] }
 0x315   : > { %v1731_v57 = vpop.permute.xlu1 %1730  ;;  %v1735_v2 = vpop.permute.xlu0 %1734 }
 0x316   : > { %v1739_v6 = vadd.f32 %v1731_v57, %v1719_v19  ;;  %v1790_v39 = vpop.permute.xlu2 %1789  ;;  %v1741_v44 = vadd.f32 %v1735_v2, %v1721_v52  ;;  %v2136_v52 = vmul.f32 %v3495_v34, %v2134_v37 }
 0x317   : > { %v1797_v38 = vadd.f32 %v1790_v39, %v1777_v63 }
 0x318   : > { %v1745_v47 = vrot.slane %v1739_v6, 3  ;;  %v1748_v31 = vrot.slane %v1741_v44, 3 }
 0x31a   : > { %v1747_v15 = vsel %vm826_vm7, %v1745_v47, %v1746_v61  ;;  %v1749_v58 = vsel %vm826_vm7, %v1746_v61, %v1748_v31  ;;  %v2114_v30 = vstv %s2424_s2 }
 0x31b   : > { %v3522_v13 = vadd.f32 %v1747_v15, %v3471_v49  ;;  %v3525_v53 = vadd.f32 %v1749_v58, %v3474_v10  ;;  %2101 = vrot.lane.b32.xlu1 %v2095_v59, %s2678_s28  ;;  %2105 = vrot.lane.b32.xlu0 %v2097_v14, %s2678_s28  ;;  %v1997_v49 = vstv %s2418_s13  ;;  %v2115_v33 = vmul.f32 %v3464_v62, %v2114_v30  ;;  %s2600_s13 = scalar_lea.hbm %s3610_s3, 32 }
 0x31c   : > { %1986 = vrot.lane.b32.xlu2 %v1979_v9, %s2677_s27  ;;  %v1998_v10 = vmul.f32 %v3464_v62, %v1997_v49  ;;  %v2000_v26 = vmul.f32 %v3515_v3, %v1997_v49  ;;  %v2117_v43 = vmul.f32 %v3515_v3, %v2114_v30  ;;  %v1999_v55 = vmul.f32 %v3495_v34, %v1997_v49  ;;  %p2602_p12 = scmp.lt.s32.totalorder %s2600_s13, %s2596_s12 }
 0x31d   : > { %v1768_v17 = vpop.permute.xlu1 %1767  ;;  %v1772_v21 = vpop.permute.xlu0 %1771  ;;  %v2116_v35 = vmul.f32 %v3495_v34, %v2114_v30 }
 0x31e   : > { %v1776_v23 = vadd.f32 %v1768_v17, %v1756_v56  ;;  %v1810_v20 = vpop.permute.xlu2 %1809  ;;  %v1778_v24 = vadd.f32 %v1772_v21, %v1758_v16  ;;  %p2603_p0 = por %p2602_p12, %p2601_p11 }
 0x31f   : > { %v1817_v25 = vadd.f32 %v1810_v20, %v1797_v38 }
 0x320   : > { %p2604_p1 = pnand %p2603_p0, %p2599_p7 }
 0x323   : > { %2004 = vrot.lane.b32.xlu1 %v1998_v10, %s2679_s7  ;;  %2008 = vrot.lane.b32.xlu0 %v2000_v26, %s2679_s7 }
 0x324   : > { %2103 = vrot.lane.b32.xlu2 %v2096_v46, %s2678_s28  ;;  %s2412_s28 = sld [smem:[#allocation11 + $0x54]] }
 0x325   : > { %v1788_v7 = vpop.permute.xlu1 %1787  ;;  %v1792_v8 = vpop.permute.xlu0 %1791 }
 0x326   : > { %v1796_v11 = vadd.f32 %v1788_v7, %v1776_v23  ;;  %v1830_v28 = vpop.permute.xlu2 %1829  ;;  %v1798_v29 = vadd.f32 %v1792_v8, %v1778_v24 }
 0x327   : > { %v1837_v27 = vadd.f32 %v1830_v28, %v1817_v25 }
 0x32a   : > { %v1892_v60 = vstv %s2412_s28 }
 0x32b   : > { %2121 = vrot.lane.b32.xlu1 %v2115_v33, %s2677_s27  ;;  %2125 = vrot.lane.b32.xlu0 %v2117_v43, %s2677_s27  ;;  %v1894_v0 = vmul.f32 %v3495_v34, %v1892_v60  ;;  %v1893_v16 = vmul.f32 %v3464_v62, %v1892_v60  ;;  %v1895_v17 = vmul.f32 %v3515_v3, %v1892_v60 }
 0x32c   : > { %2006 = vrot.lane.b32.xlu2 %v1999_v55, %s2679_s7 }
 0x32d   : > { %v1808_v22 = vpop.permute.xlu1 %1807  ;;  %v1812_v18 = vpop.permute.xlu0 %1811 }
 0x32e   : > { %v1816_v36 = vadd.f32 %v1808_v22, %v1796_v11  ;;  %v1850_v54 = vpop.permute.xlu2 %1849  ;;  %v1818_v4 = vadd.f32 %v1812_v18, %v1798_v29 }
 0x32f   : > { %v1857_v41 = vadd.f32 %v1850_v54, %v1837_v27 }
 0x333   : > { %2141 = vrot.lane.b32.xlu1 %v2135_v40, %s2679_s7  ;;  %2145 = vrot.lane.b32.xlu0 %v2137_v42, %s2679_s7 }
 0x334   : > { %2123 = vrot.lane.b32.xlu2 %v2116_v35, %s2677_s27  ;;  %s2419_s27 = sld [smem:[#allocation11 + $0x5b]] }
 0x335   : > { %v1828_v45 = vpop.permute.xlu1 %1827  ;;  %v1832_v48 = vpop.permute.xlu0 %1831 }
 0x336   : > { %v1836_v50 = vadd.f32 %v1828_v45, %v1816_v36  ;;  %v1870_v5 = vpop.permute.xlu2 %1869  ;;  %v1838_v19 = vadd.f32 %v1832_v48, %v1818_v4 }
 0x337   : > { %v1877_v51 = vadd.f32 %v1870_v5, %v1857_v41 }
 0x339   : > { %v1883_v31 = vrot.slane %v1877_v51, 4 }
 0x33c   : > { %2143 = vrot.lane.b32.xlu2 %v2136_v52, %s2679_s7  ;;  %v2029_v52 = vstv %s2419_s27  ;;  %s2328_s7 = sshll.u32 %s2806_s9, 4 }
 0x33d   : > { %v1848_v63 = vpop.permute.xlu1 %1847  ;;  %v1852_v1 = vpop.permute.xlu0 %1851  ;;  %s222_s22 = scalar_lea.vmem [#allocation12], %s2328_s7 }
 0x33e   : > { %v1856_v12 = vadd.f32 %v1848_v63, %v1836_v50  ;;  %v1907_v57 = vpop.permute.xlu2 %1906  ;;  %v1858_v2 = vadd.f32 %v1852_v1, %v1838_v19  ;;  %s2218_s24 = sshll.u32 %s222_s22, 4  ;;  %s2219_s24 = int_to_ptr.vmem [resolvable:$true] %s2218_s24 }
 0x33f   : > { %v1914_v6 = vadd.f32 %v1907_v57, %v1894_v0  ;;  %v2031_v57 = vmul.f32 %v3495_v34, %v2029_v52 }
 0x345   : > { %v1868_v39 = vpop.permute.xlu1 %1867  ;;  %v1872_v44 = vpop.permute.xlu0 %1871 }
 0x346   : > { %v1876_v32 = vadd.f32 %v1868_v39, %v1856_v12  ;;  %v1927_v38 = vpop.permute.xlu2 %1926  ;;  %v1878_v61 = vadd.f32 %v1872_v44, %v1858_v2 }
 0x347   : > { %v1934_v47 = vadd.f32 %v1927_v38, %v1914_v6 }
 0x348   : > { %v1882_v59 = vrot.slane %v1876_v32, 4  ;;  %v1885_v14 = vrot.slane %v1878_v61, 4 }
 0x34a   : > { %v1884_v15 = vsel %vm964_vm8, %v1882_v59, %v1883_v31  ;;  %v1886_v58 = vsel %vm964_vm8, %v1883_v31, %v1885_v14  ;;  %v2030_v31 = vmul.f32 %v3464_v62, %v2029_v52 }
 0x34b   : > { %v1889_v9 = vadd.f32 %v1884_v15, %v3522_v13  ;;  %v1890_v56 = vadd.f32 %v1886_v58, %v3525_v53 }
 0x34d   : > { %v1905_v21 = vpop.permute.xlu1 %1904  ;;  %v1909_v23 = vpop.permute.xlu0 %1908 }
 0x34e   : > { %v1913_v20 = vadd.f32 %v1905_v21, %v1893_v16  ;;  %v1947_v24 = vpop.permute.xlu2 %1946  ;;  %v1915_v49 = vadd.f32 %v1909_v23, %v1895_v17 }
 0x34f   : > { %v1954_v25 = vadd.f32 %v1947_v24, %v1934_v47  ;;  %v2032_v47 = vmul.f32 %v3515_v3, %v2029_v52 }
 0x355   : > { %v1925_v10 = vpop.permute.xlu1 %1924  ;;  %v1929_v26 = vpop.permute.xlu0 %1928 }
 0x356   : > { %v1933_v46 = vadd.f32 %v1925_v10, %v1913_v20  ;;  %v2046_v7 = vpop.permute.xlu2 %2045  ;;  %v1935_v8 = vadd.f32 %v1929_v26, %v1915_v49 }
 0x357   : > { %v2052_v16 = vadd.f32 %v2046_v7, %v2032_v47 }
 0x35d   : > { %v1945_v11 = vpop.permute.xlu1 %1944  ;;  %v2042_v28 = vpop.permute.xlu0 %2041 }
 0x35e   : > { %v1953_v13 = vadd.f32 %v1945_v11, %v1933_v46  ;;  %v2064_v29 = vpop.permute.xlu2 %2063  ;;  %v2050_v17 = vadd.f32 %v2042_v28, %v2030_v31 }
 0x365   : > { %v2044_v53 = vpop.permute.xlu1 %2043  ;;  %v1949_v30 = vpop.permute.xlu0 %1948 }
 0x366   : > { %v1967_v27 = vpop.permute.xlu2 %1966  ;;  %v1955_v50 = vadd.f32 %v1949_v30, %v1935_v8  ;;  %v2051_v44 = vadd.f32 %v2044_v53, %v2031_v57 }
 0x367   : > { %v1974_v48 = vadd.f32 %v1967_v27, %v1954_v25 }
 0x368   : > { %v2071_v34 = vadd.f32 %v2064_v29, %v2051_v44 }
 0x36d   : > { %v2062_v33 = vpop.permute.xlu1 %2061  ;;  %v2066_v43 = vpop.permute.xlu0 %2065 }
 0x36e   : > { %v2084_v55 = vpop.permute.xlu2 %2083  ;;  %v2070_v20 = vadd.f32 %v2062_v33, %v2050_v17  ;;  %v2072_v49 = vadd.f32 %v2066_v43, %v2052_v16 }
 0x36f   : > { %v2091_v24 = vadd.f32 %v2084_v55, %v2071_v34 }
 0x375   : > { %v1965_v22 = vpop.permute.xlu1 %1964  ;;  %v1969_v18 = vpop.permute.xlu0 %1968 }
 0x376   : > { %v1987_v36 = vpop.permute.xlu2 %1986  ;;  %v1973_v5 = vadd.f32 %v1965_v22, %v1953_v13  ;;  %v1975_v51 = vadd.f32 %v1969_v18, %v1955_v50 }
 0x377   : > { %v1994_v19 = vadd.f32 %v1987_v36, %v1974_v48 }
 0x37d   : > { %v2082_v54 = vpop.permute.xlu1 %2081  ;;  %v2086_v4 = vpop.permute.xlu0 %2085 }
 0x37e   : > { %v2104_v37 = vpop.permute.xlu2 %2103  ;;  %v2090_v25 = vadd.f32 %v2082_v54, %v2070_v20  ;;  %v2092_v26 = vadd.f32 %v2086_v4, %v2072_v49 }
 0x37f   : > { %v2111_v10 = vadd.f32 %v2104_v37, %v2091_v24 }
 0x385   : > { %v1985_v41 = vpop.permute.xlu1 %1984  ;;  %v1989_v40 = vpop.permute.xlu0 %1988 }
 0x386   : > { %v2007_v42 = vpop.permute.xlu2 %2006  ;;  %v1993_v60 = vadd.f32 %v1985_v41, %v1973_v5  ;;  %v1995_v0 = vadd.f32 %v1989_v40, %v1975_v51 }
 0x387   : > { %v2014_v63 = vadd.f32 %v2007_v42, %v1994_v19 }
 0x389   : > { %v2020_v32 = vrot.slane %v2014_v63, 5 }
 0x38d   : > { %v2102_v35 = vpop.permute.xlu1 %2101  ;;  %v2106_v45 = vpop.permute.xlu0 %2105 }
 0x38e   : > { %v2124_v39 = vpop.permute.xlu2 %2123  ;;  %v2110_v46 = vadd.f32 %v2102_v35, %v2090_v25  ;;  %v2112_v8 = vadd.f32 %v2106_v45, %v2092_v26 }
 0x38f   : > { %v2131_v62 = vadd.f32 %v2124_v39, %v2111_v10 }
 0x395   : > { %v2005_v1 = vpop.permute.xlu1 %2004  ;;  %v2009_v12 = vpop.permute.xlu0 %2008 }
 0x396   : > { %v2013_v2 = vadd.f32 %v2005_v1, %v1993_v60  ;;  %v2015_v6 = vadd.f32 %v2009_v12, %v1995_v0  ;;  %v2144_v3 = vpop.permute.xlu2 %2143 }
 0x397   : > { %v2151_v11 = vadd.f32 %v2144_v3, %v2131_v62 }
 0x398   : > { %v2019_v38 = vrot.slane %v2013_v2, 5  ;;  %v2022_v61 = vrot.slane %v2015_v6, 5 }
 0x399   : > { %v2157_v29 = vrot.slane %v2151_v11, 6 }
 0x39a   : > { %v2021_v59 = vsel %vm1102_vm9, %v2019_v38, %v2020_v32  ;;  %v2023_v14 = vsel %vm1102_vm9, %v2020_v32, %v2022_v61 }
 0x39b   : > { %v2026_v15 = vadd.f32 %v2021_v59, %v1889_v9  ;;  %v2027_v58 = vadd.f32 %v2023_v14, %v1890_v56 }
 0x39d   : > { %v2122_v21 = vpop.permute.xlu1 %2121  ;;  %v2126_v23 = vpop.permute.xlu0 %2125 }
 0x39e   : > { %v2130_v13 = vadd.f32 %v2122_v21, %v2110_v46  ;;  %v2132_v53 = vadd.f32 %v2126_v23, %v2112_v8 }
 0x3a5   : > { %v2142_v9 = vpop.permute.xlu1 %2141  ;;  %v2146_v56 = vpop.permute.xlu0 %2145 }
 0x3a6   : > { %v2150_v7 = vadd.f32 %v2142_v9, %v2130_v13  ;;  %v2152_v28 = vadd.f32 %v2146_v56, %v2132_v53 }
 0x3a8   : > { %v2156_v30 = vrot.slane %v2150_v7, 6  ;;  %v2159_v27 = vrot.slane %v2152_v28, 6 }
 0x3aa   : > { %v2158_v33 = vsel %vm1240_vm10, %v2156_v30, %v2157_v29  ;;  %v2160_v43 = vsel %vm1240_vm10, %v2157_v29, %v2159_v27 }
 0x3ab   : > { %v2163_v55 = vadd.f32 %v2158_v33, %v2026_v15  ;;  %v2164_v22 = vadd.f32 %v2160_v43, %v2027_v58 }
 0x3ad   : > { %v2426_v18 = vmul.f32 -1.442695, %v2163_v55  ;;  %v2427_v36 = vmul.f32 -1.442695, %v2164_v22 }
 0x3af   : > { %2521 = vpow2.f32 %v2426_v18 }
 0x3b0   : > { %2523 = vpow2.f32 %v2427_v36 }
 0x3b5   : > { %v2522_v54 = vpop.eup %2521 }
 0x3b6   : > { %v2524_v4 = vpop.eup %2523  ;;  %v2171_v37 = vadd.f32 1.0, %v2522_v54 }
 0x3b7   : > { %v2172_v41 = vadd.f32 1.0, %v2524_v4 }
 0x3b8   : > { %2525 = vrcp.f32 %v2171_v37  ;;  %v2184_v5 = vand.u32 2147483648, %v2171_v37  ;;  %v2182_v51 = vand.u32 2147483647, %v2171_v37  ;;  %vm2178_vm13 = vweird.f32 %v2171_v37 }
 0x3b9   : > { %2527 = vrcp.f32 %v2172_v41  ;;  %v2199_v52 = vand.u32 2147483648, %v2172_v41  ;;  %v2197_v63 = vand.u32 2147483647, %v2172_v41  ;;  %vm2193_vm15 = vweird.f32 %v2172_v41 }
 0x3ba   : > { %v2185_v1 = vor.u32 1.1754944e-38, %v2184_v5  ;;  %vm2183_vm1 = vcmp.eq.f32.partialorder %v2182_v51, 8.507059e+37 }
 0x3bb   : > { %v2200_v2 = vor.u32 1.1754944e-38, %v2199_v52  ;;  %vm2198_vm3 = vcmp.eq.f32.partialorder %v2197_v63, 8.507059e+37 }
 0x3be   : > { %v2526_v40 = vpop.eup %2525 }
 0x3bf   : > { %v2528_v42 = vpop.eup %2527  ;;  %v2174_v35 = vmul.f32 %v2526_v40, %v2171_v37  ;;  %vm2179_vm11 = vweird.f32 %v2526_v40 }
 0x3c0   : > { %v2189_v45 = vmul.f32 %v2528_v42, %v2172_v41  ;;  %vm2194_vm12 = vweird.f32 %v2528_v42  ;;  %vm2180_vm14 = vmor %vm2178_vm13, %vm2179_vm11 }
 0x3c1   : > { %v2175_v48 = vsub.f32 1.0, %v2174_v35  ;;  %vm2195_vm2 = vmor %vm2193_vm15, %vm2194_vm12 }
 0x3c2   : > { %v2190_v50 = vsub.f32 1.0, %v2189_v45 }
 0x3c3   : > { %v2176_v19 = vmul.f32 %v2526_v40, %v2175_v48 }
 0x3c4   : > { %v2191_v60 = vmul.f32 %v2528_v42, %v2190_v50 }
 0x3c5   : > { %v2177_v0 = vadd.f32 %v2526_v40, %v2176_v19 }
 0x3c6   : > { %v2192_v12 = vadd.f32 %v2528_v42, %v2191_v60 }
 0x3c7   : > { %v2181_v57 = vsel %vm2180_vm14, %v2526_v40, %v2177_v0 }
 0x3c8   : > { %v2186_v6 = vsel %vm2183_vm1, %v2185_v1, %v2181_v57  ;;  %v2196_v39 = vsel %vm2195_vm2, %v2528_v42, %v2192_v12 }
 0x3c9   : > { %v2201_v44 = vsel %vm2198_vm3, %v2200_v2, %v2196_v39  ;;  %2203 = vst.msk [vmem:[%s222_s22] sm:$0xff] %vm228_vm0, %v2186_v6 }
 0x3ca   : > { %2204 = vst.msk [vmem:[%s222_s22 + $0x8] sm:$0xff] %vm228_vm0, %v2201_v44 }
 0x3cb   : > { %2607 = shalt.err (!%p2604_p1)
}
 0x3cc   : > { %s2680_s9 = smov 128   ;;  %s2681_s28 = smov 8  }
 0x3cd   : > { %2441 = dma.vmem_to_hbm [thread:$0]  (%p2757_p8), %s2219_s24, 256, %s2221_s17, %s2206_s30, %s2680_s9, %s2680_s9, %s2681_s28  }
 0x3ce PF: > { %s2235_s27 = sand.u32 1, %s2646_s14   ;;  %p2452_p2 = pnand %p2321_p13, %p2761_p9 }
 0x3cf   : > { %s2236_s7 = scalar_lea.sflag [#allocation9], %s2235_s27 }
 0x3d0   : > { %p2453_p4 = pneg %p2452_p2 }
 0x3d2   : > { %2641 = dma.done.wait (%p2453_p4), %s2236_s7, 256  }
 0x3d3   : > { %2643 = vsyncadd (%p2453_p4), %s2236_s7, 4294967040  ;;  %s21_s19 = sadd.s32 1, %s2666_s19   ;;  %s3618_s14 = smov %s2650_s15 }
 0x3d4   : > { %p18_p6 = scmp.ge.s32.totalorder %s21_s19, 4   ;;  %s3619_s15 = smov %s2654_s16 }
 0x3d5   : > { %s3620_s16 = smov %s2799_s23  ;;  %s3621_s17 = smov %s2662_s18 }
 0x3d6   : > { %s3622_s18 = smov %s3624_s5  ;;  %20 = sbr.rel (!%p18_p6) target bundleno = 9 (0x9), region = 90 }
 0x3db   :  { %2242 = vsyncpa [#allocation8], 1 }
 0x3dc   :  { %2244 = vsyncpa [#allocation8 + $0x1], 1 }
 0x3dd   :  { %2245 = vsyncpa [#allocation9], 1 }
 0x3de   :  { %2247 = vsyncpa [#allocation9 + $0x1], 1 }
 0x3df   :  { %2248 = vsyncpa [#allocation10], 1 }
 0x3e0   :  { %2250 = vsyncpa [#allocation10 + $0x1], 1 }

</bundles_post_ra>
